<compile_context>
chip_gen: v7x
topology: tpu7x:2x2x1
jax: 0.10.0
libtpu: 0.0.40
codegen_flags: <defaults>
</compile_context>

<pallas_src>
import math

import jax
import jax.numpy as jnp
from jax import lax
from jax.experimental import pallas as pl
from jax.experimental.pallas import tpu as pltpu


# ----------------------------------------------------------------------------
# Pass 1: fused Q/K/V projection for one (batch, sequence-tile).
# ----------------------------------------------------------------------------
def qkv_proj_kernel(
    x_ref,                                  # (1, ts, D)  f32
    wqT_ref, wkT_ref, wvT_ref,              # (D, D)      bf16 (wq pre-scaled by 1/sqrt(Dh))
    bqT_ref, bkT_ref, bvT_ref,              # (D, 1)      f32
    q_ref,                                  # (1, H, ts, Dh) bf16
    k_ref, v_ref,                           # (1, H, Dh, ts) bf16
):
    _, ts, D = x_ref.shape
    _, H, Dh, _ = k_ref.shape
    bf16 = jnp.bfloat16
    rhs_t = (((1,), (1,)), ((), ()))        # A @ B^T (contract last dims of both)

    xb = x_ref[0].astype(bf16)              # (ts, D)
    qT = lax.dot_general(wqT_ref[...], xb, rhs_t,
                         preferred_element_type=jnp.float32) + bqT_ref[...]   # (D, ts)
    kT = lax.dot_general(wkT_ref[...], xb, rhs_t,
                         preferred_element_type=jnp.float32) + bkT_ref[...]
    vT = lax.dot_general(wvT_ref[...], xb, rhs_t,
                         preferred_element_type=jnp.float32) + bvT_ref[...]

    # K/V stay head-major transposed (H, Dh, ts): consumed directly by the attention
    # matmuls in pass 2.  Q is additionally transposed to (H, ts, Dh) here, once per
    # sequence tile, so the hot per-query-tile kernel contains no XLU transpose.
    k_ref[0] = kT.reshape(H, Dh, ts).astype(bf16)
    v_ref[0] = vT.reshape(H, Dh, ts).astype(bf16)
    q_ref[0] = jnp.swapaxes(qT.reshape(H, Dh, ts), 1, 2).astype(bf16)


# ----------------------------------------------------------------------------
# Pass 2: attention + FFN + LayerNorms for one (batch, query-tile).
# ----------------------------------------------------------------------------
def encoder_layer_kernel(
    x_ref,                                  # (1, tq, D)      f32  (residual input)
    q_ref,                                  # (1, H, tq, Dh)  bf16
    k_ref, v_ref,                           # (1, H, Dh, S)   bf16
    wo_ref, bo_ref,                         # (D, D) bf16, (1, D) f32
    w1_ref, b1_ref,                         # (D, F) bf16, (1, F) f32
    w2_ref, b2_ref,                         # (F, D) bf16, (1, D) f32
    g1_ref, be1_ref,                        # (1, D) f32  LayerNorm1 gamma / beta
    g2_ref, be2_ref,                        # (1, D) f32  LayerNorm2 gamma / beta
    o_ref,                                  # (1, tq, D)
):
    _, tq, D = x_ref.shape
    _, H, Dh, S = k_ref.shape
    eps = 1e-5
    bf16 = jnp.bfloat16

    xq = x_ref[0]                           # (tq, D) f32
    q = q_ref[0]                            # (H, tq, Dh) bf16
    k = k_ref[0]                            # (H, Dh, S)  bf16
    v = v_ref[0]                            # (H, Dh, S)  bf16

    # --- scaled dot-product attention, heads batched on the leading axis -------
    # scores[h, q, s] = sum_d q[h, q, d] * k[h, d, s]   (canonical batched matmul)
    scores = lax.dot_general(q, k, (((2,), (1,)), ((0,), (0,))),
                             preferred_element_type=jnp.float32)    # (H, tq, S) f32
    m = jnp.max(scores, axis=-1, keepdims=True)
    p = jnp.exp(scores - m)                                         # unnormalized
    l = jnp.sum(p, axis=-1, keepdims=True)

    # Deferred softmax normalization: feed unnormalized probs (single bf16 cast of the
    # big tensor) into PV, rescale the small ctx instead (H*tq*Dh vs H*tq*S multiplies).
    ctx = lax.dot_general(p.astype(bf16), v, (((2,), (2,)), ((0,), (0,))),
                          preferred_element_type=jnp.float32)       # (H, tq, Dh) f32
    ctx = ctx * pl.reciprocal(l, approx=True)

    # Head concat -> (tq, D), then ONE K=D output projection on the MXU.
    ctx_c = jnp.concatenate([ctx[h] for h in range(H)], axis=-1).astype(bf16)   # (tq, D)
    attn = jnp.dot(ctx_c, wo_ref[...],
                   preferred_element_type=jnp.float32) + bo_ref[...]            # (tq, D)

    # --- residual + LayerNorm 1 (f32) -------------------------------------------
    h1 = xq + attn
    mu1 = jnp.mean(h1, axis=-1, keepdims=True)
    var1 = jnp.mean((h1 - mu1) ** 2, axis=-1, keepdims=True)
    h1 = (h1 - mu1) * lax.rsqrt(var1 + eps) * g1_ref[...] + be1_ref[...]

    # --- feed-forward (dropout = identity) --------------------------------------
    f = jnp.dot(h1.astype(bf16), w1_ref[...],
                preferred_element_type=jnp.float32) + b1_ref[...]               # (tq, F)
    f = jnp.maximum(f, 0.0)
    y = jnp.dot(f.astype(bf16), w2_ref[...],
                preferred_element_type=jnp.float32) + b2_ref[...]               # (tq, D)

    # --- residual + LayerNorm 2 (f32) -------------------------------------------
    h2 = h1 + y
    mu2 = jnp.mean(h2, axis=-1, keepdims=True)
    var2 = jnp.mean((h2 - mu2) ** 2, axis=-1, keepdims=True)
    out = (h2 - mu2) * lax.rsqrt(var2 + eps) * g2_ref[...] + be2_ref[...]

    o_ref[0] = out.astype(o_ref.dtype)


# ----------------------------------------------------------------------------
# Wrapper helpers
# ----------------------------------------------------------------------------
def _const_spec(shape):
    # Constant-index block: fetched once (block index never changes).
    return pl.BlockSpec(shape, lambda *_: (0,) * len(shape))


def _pick_tile(S):
    for cand in (256, 128):
        if S % cand == 0:
            return cand
    # TODO(synk): pad S instead; a single full-sequence tile can blow VMEM for huge S.
    return S


def _vmem_cap_bytes():
    # Physical VMEM differs per generation (v5e/v6e: 128 MiB, v7x: 64 MiB / TC).
    try:
        return int(getattr(pltpu.get_tpu_info(), "vmem_capacity_bytes", 64 * 2**20))
    except Exception:
        return 64 * 2**20


def _vmem_limit_bytes(estimate):
    return int(min(max(2 * estimate, 32 * 2**20), _vmem_cap_bytes()))


# ----------------------------------------------------------------------------
# Wrapper
# ----------------------------------------------------------------------------
def transformer_encoder_layer(src, params, num_heads, *, tq=None):
    """src: (S, B, D) float32, params as from init_params. Returns (S, B, D)."""
    S, B, D = src.shape
    H = num_heads
    assert D % H == 0, "d_model must be divisible by num_heads"
    Dh = D // H
    F = params["w1"].shape[1]
    # Lane-density / tiling contract.
    assert D % 128 == 0 and F % 128 == 0, "d_model / dim_feedforward must be multiples of 128"
    assert Dh % 8 == 0, "head_dim must be a multiple of 8"
    assert S % 8 == 0, "sequence length must be a multiple of 8"
    if tq is None or S % tq != 0:
        tq = _pick_tile(S)
    assert S % tq == 0 and tq % 8 == 0
    ts = tq

    bf16, f32 = jnp.bfloat16, jnp.float32
    scale = 1.0 / math.sqrt(Dh)

    # Host-side parameter prep (one-time layout work, no in-kernel cost):
    #  * q/k/v weights transposed so the projection is a plain A @ B^T matmul producing
    #    head-major (D_out, rows); 1/sqrt(Dh) folded into wq/bq.
    #  * output projection kept as a single (D, D) matrix (head-concat in-kernel).
    #  * matmul weights cast to bf16 (f32 accumulation in-kernel), biases/LN in f32.
    wqT = jnp.asarray((params["wq"] * scale).T, bf16)
    wkT = jnp.asarray(params["wk"].T, bf16)
    wvT = jnp.asarray(params["wv"].T, bf16)
    bqT = jnp.asarray(params["bq"] * scale, f32).reshape(D, 1)
    bkT = jnp.asarray(params["bk"], f32).reshape(D, 1)
    bvT = jnp.asarray(params["bv"], f32).reshape(D, 1)
    wo = jnp.asarray(params["wo"], bf16)
    bo = jnp.asarray(params["bo"], f32).reshape(1, D)
    w1 = jnp.asarray(params["w1"], bf16)
    b1 = jnp.asarray(params["b1"], f32).reshape(1, F)
    w2 = jnp.asarray(params["w2"], bf16)
    b2 = jnp.asarray(params["b2"], f32).reshape(1, D)
    g1 = jnp.asarray(params["g1"], f32).reshape(1, D)
    be1 = jnp.asarray(params["be1"], f32).reshape(1, D)
    g2 = jnp.asarray(params["g2"], f32).reshape(1, D)
    be2 = jnp.asarray(params["be2"], f32).reshape(1, D)

    qkv_params = [wqT, wkT, wvT, bqT, bkT, bvT]
    main_params = [wo, bo, w1, b1, w2, b2, g1, be1, g2, be2]

    # (S, B, D) -> (B, S, D) once, shared by both kernels (see batch-first TODO above).
    x = jnp.transpose(src, (1, 0, 2))

    # Explicit VMEM budget: block buffers + weights + in-kernel intermediates, clamped
    # to the current generation's physical VMEM (important on v7x's 64 MiB).
    param_bytes = sum(int(p.nbytes) for p in main_params + qkv_params)
    est = (2 * tq * D * 4          # x residual block (double-buffered)
           + 2 * tq * D * 2        # q block (bf16)
           + 2 * 2 * D * S * 2     # k / v blocks (bf16, double-buffered)
           + 2 * tq * D * 4        # output block
           + 2 * param_bytes       # weight/bias blocks (double-buffered; see TODO)
           + 4 * H * tq * S * 4    # scores / exp / bf16 probs intermediates
           + 2 * tq * F * 4        # FFN intermediate
           + 6 * tq * D * 4)       # misc f32 temporaries
    vmem_limit = _vmem_limit_bytes(est)

    # ---- Pass 1: Q/K/V projection (no qi==0 bubble in the main kernel) ----------
    q_hm, k_hm, v_hm = pl.pallas_call(
        qkv_proj_kernel,
        out_shape=(jax.ShapeDtypeStruct((B, H, S, Dh), bf16),
                   jax.ShapeDtypeStruct((B, H, Dh, S), bf16),
                   jax.ShapeDtypeStruct((B, H, Dh, S), bf16)),
        grid=(B, S // ts),
        in_specs=[pl.BlockSpec((1, ts, D), lambda b, si: (b, si, 0))]
                 + [_const_spec(p.shape) for p in qkv_params],
        out_specs=(pl.BlockSpec((1, H, ts, Dh), lambda b, si: (b, 0, si, 0)),
                   pl.BlockSpec((1, H, Dh, ts), lambda b, si: (b, 0, 0, si)),
                   pl.BlockSpec((1, H, Dh, ts), lambda b, si: (b, 0, 0, si))),
        compiler_params=pltpu.CompilerParams(
            dimension_semantics=("parallel", "parallel"),
            vmem_limit_bytes=vmem_limit),
    )(x, *qkv_params)

    # ---- Pass 2: attention + FFN + LayerNorms ------------------------------------
    out = pl.pallas_call(
        encoder_layer_kernel,
        out_shape=jax.ShapeDtypeStruct((B, S, D), src.dtype),
        grid=(B, S // tq),
        in_specs=[pl.BlockSpec((1, tq, D), lambda b, qi: (b, qi, 0)),
                  pl.BlockSpec((1, H, tq, Dh), lambda b, qi: (b, 0, qi, 0)),
                  pl.BlockSpec((1, H, Dh, S), lambda b, qi: (b, 0, 0, 0)),
                  pl.BlockSpec((1, H, Dh, S), lambda b, qi: (b, 0, 0, 0))]
                 + [_const_spec(p.shape) for p in main_params],
        out_specs=pl.BlockSpec((1, tq, D), lambda b, qi: (b, qi, 0)),
        compiler_params=pltpu.CompilerParams(
            dimension_semantics=("parallel", "parallel"),
            vmem_limit_bytes=vmem_limit),
    )(x, q_hm, k_hm, v_hm, *main_params)

    return jnp.transpose(out, (1, 0, 2))


# ----------------------------------------------------------------------------
# Pure-JAX f32 reference (PyTorch semantics, eval mode) for a sanity check
# ----------------------------------------------------------------------------
def reference(src, p, num_heads):
    S, B, D = src.shape
    H = num_heads
    Dh = D // H
    eps = 1e-5
    x = jnp.transpose(src, (1, 0, 2)).astype(jnp.float32)   # (B, S, D)

    q = x @ p["wq"] + p["bq"]
    k = x @ p["wk"] + p["bk"]
    v = x @ p["wv"] + p["bv"]
    q = q / jnp.sqrt(jnp.float32(Dh))
    qh = q.reshape(B, S, H, Dh).transpose(0, 2, 1, 3)
    kh = k.reshape(B, S, H, Dh).transpose(0, 2, 1, 3)
    vh = v.reshape(B, S, H, Dh).transpose(0, 2, 1, 3)
    scores = jnp.einsum("bhqd,bhkd->bhqk", qh, kh)
    probs = jax.nn.softmax(scores, axis=-1)
    ctx = jnp.einsum("bhqk,bhkd->bhqd", probs, vh)
    ctx = ctx.transpose(0, 2, 1, 3).reshape(B, S, D)
    attn = ctx @ p["wo"] + p["bo"]

    def ln(y, g, b):
        mu = jnp.mean(y, axis=-1, keepdims=True)
        var = jnp.mean((y - mu) ** 2, axis=-1, keepdims=True)
        return (y - mu) * jax.lax.rsqrt(var + eps) * g + b

    h1 = ln(x + attn, p["g1"], p["be1"])
    f = jnp.maximum(h1 @ p["w1"] + p["b1"], 0.0) @ p["w2"] + p["b2"]
    h2 = ln(h1 + f, p["g2"], p["be2"])
    return jnp.transpose(h2, (1, 0, 2))


# ----------------------------------------------------------------------------
# Deterministic parameter init + demo
# ----------------------------------------------------------------------------
def init_params(key, d_model, num_heads, dim_feedforward):
    D, F = d_model, dim_feedforward
    ks = jax.random.split(key, 12)
    w = lambda k, s: (jax.random.normal(k, s, jnp.float32) * 0.05)
    params = {
        # projection weights stored as y = x @ W, biases as (1, N)
        "wq": w(ks[0], (D, D)), "wk": w(ks[1], (D, D)), "wv": w(ks[2], (D, D)),
        "bq": w(ks[3], (1, D)), "bk": w(ks[4], (1, D)), "bv": w(ks[5], (1, D)),
        "wo": w(ks[6], (D, D)), "bo": w(ks[7], (1, D)),
        "w1": w(ks[8], (D, F)), "b1": w(ks[9], (1, F)),
        "w2": w(ks[10], (F, D)), "b2": w(ks[11], (1, D)),
        "g1": jnp.ones((1, D), jnp.float32) + 0.01,
        "be1": jnp.full((1, D), 0.02, jnp.float32),
        "g2": jnp.ones((1, D), jnp.float32) - 0.01,
        "be2": jnp.full((1, D), -0.02, jnp.float32),
    }
    return params


if __name__ == "__main__":
    S, B, D = 256, 2, 128       # seq, batch, d_model (lane-dense: D multiple of 128)
    H, F = 4, 256               # num_heads (Dh=32), dim_feedforward

    key = jax.random.PRNGKey(0)
    k_x, k_p = jax.random.split(key)
    src = jax.random.normal(k_x, (S, B, D), jnp.float32)
    params = init_params(k_p, D, H, F)

    out = transformer_encoder_layer(src, params, num_heads=H)
    out = jax.block_until_ready(out)

    ref = reference(src, params, num_heads=H)
    assert out.shape == (S, B, D)
    # bf16 matmul operands (f32 accumulation) + approx softmax reciprocal vs. f32
    # reference -> loose-ish tolerance.
    assert jnp.allclose(out, ref, rtol=3e-2, atol=3e-2), "mismatch vs reference"

    print("KERNEL_OK")
</pallas_src>

<mosaic_0001>
module attributes {stable_mosaic.version = 11 : i64} {
  func.func @qkv_proj_kernel(%arg0: i32, %arg1: i32, %arg2: memref<1x256x128xf32, #tpu.memory_space<vmem>>, %arg3: memref<128x128xbf16, #tpu.memory_space<vmem>>, %arg4: memref<128x128xbf16, #tpu.memory_space<vmem>>, %arg5: memref<128x128xbf16, #tpu.memory_space<vmem>>, %arg6: memref<128x1xf32, #tpu.memory_space<vmem>>, %arg7: memref<128x1xf32, #tpu.memory_space<vmem>>, %arg8: memref<128x1xf32, #tpu.memory_space<vmem>>, %arg9: memref<1x4x256x32xbf16, #tpu.memory_space<vmem>>, %arg10: memref<1x4x32x256xbf16, #tpu.memory_space<vmem>>, %arg11: memref<1x4x32x256xbf16, #tpu.memory_space<vmem>>) attributes {dimension_semantics = [#tpu.dimension_semantics<parallel>, #tpu.dimension_semantics<parallel>], iteration_bounds = array<i64: 2, 1>, scalar_prefetch = 0 : i64, scratch_operands = 0 : i64, tpu.core_type = #tpu.core_type<tc>, window_params = [{transform_indices = @transform_0, window_bounds = array<i64: 1, 256, 128>}, {pipeline_mode = #tpu.pipeline_mode<synchronous>, transform_indices = @transform_1, window_bounds = array<i64: 128, 128>}, {pipeline_mode = #tpu.pipeline_mode<synchronous>, transform_indices = @transform_2, window_bounds = array<i64: 128, 128>}, {pipeline_mode = #tpu.pipeline_mode<synchronous>, transform_indices = @transform_3, window_bounds = array<i64: 128, 128>}, {pipeline_mode = #tpu.pipeline_mode<synchronous>, transform_indices = @transform_4, window_bounds = array<i64: 128, 1>}, {pipeline_mode = #tpu.pipeline_mode<synchronous>, transform_indices = @transform_5, window_bounds = array<i64: 128, 1>}, {pipeline_mode = #tpu.pipeline_mode<synchronous>, transform_indices = @transform_6, window_bounds = array<i64: 128, 1>}, {transform_indices = @transform_7, window_bounds = array<i64: 1, 4, 256, 32>}, {transform_indices = @transform_8, window_bounds = array<i64: 1, 4, 32, 256>}, {transform_indices = @transform_9, window_bounds = array<i64: 1, 4, 32, 256>}]} {
    %c0 = arith.constant 0 : index
    %c0_0 = arith.constant 0 : index
    %c0_1 = arith.constant 0 : index
    %0 = vector.load %arg2[%c0, %c0_0, %c0_1] : memref<1x256x128xf32, #tpu.memory_space<vmem>>, vector<1x256x128xf32>
    %1 = vector.shape_cast %0 : vector<1x256x128xf32> to vector<256x128xf32>
    %2 = arith.truncf %1 : vector<256x128xf32> to vector<256x128xbf16>
    %c0_2 = arith.constant 0 : index
    %c0_3 = arith.constant 0 : index
    %3 = vector.load %arg3[%c0_2, %c0_3] : memref<128x128xbf16, #tpu.memory_space<vmem>>, vector<128x128xbf16>
    %cst = arith.constant dense<0.000000e+00> : vector<128x256xf32>
    %4 = tpu.matmul %3, %2, %cst {dimension_numbers = #tpu.dot_dimension_numbers<[1], [1], [0], [0], [0, 0, 1, 0], [], []>} : vector<128x128xbf16>, vector<256x128xbf16>, vector<128x256xf32> -> vector<128x256xf32>
    %c0_4 = arith.constant 0 : index
    %c0_5 = arith.constant 0 : index
    %5 = vector.load %arg6[%c0_4, %c0_5] : memref<128x1xf32, #tpu.memory_space<vmem>>, vector<128x1xf32>
    %6 = vector.broadcast %5 : vector<128x1xf32> to vector<128x256xf32>
    %7 = arith.addf %4, %6 : vector<128x256xf32>
    %c0_6 = arith.constant 0 : index
    %c0_7 = arith.constant 0 : index
    %8 = vector.load %arg4[%c0_6, %c0_7] : memref<128x128xbf16, #tpu.memory_space<vmem>>, vector<128x128xbf16>
    %cst_8 = arith.constant dense<0.000000e+00> : vector<128x256xf32>
    %9 = tpu.matmul %8, %2, %cst_8 {dimension_numbers = #tpu.dot_dimension_numbers<[1], [1], [0], [0], [0, 0, 1, 0], [], []>} : vector<128x128xbf16>, vector<256x128xbf16>, vector<128x256xf32> -> vector<128x256xf32>
    %c0_9 = arith.constant 0 : index
    %c0_10 = arith.constant 0 : index
    %10 = vector.load %arg7[%c0_9, %c0_10] : memref<128x1xf32, #tpu.memory_space<vmem>>, vector<128x1xf32>
    %11 = vector.broadcast %10 : vector<128x1xf32> to vector<128x256xf32>
    %12 = arith.addf %9, %11 : vector<128x256xf32>
    %c0_11 = arith.constant 0 : index
    %c0_12 = arith.constant 0 : index
    %13 = vector.load %arg5[%c0_11, %c0_12] : memref<128x128xbf16, #tpu.memory_space<vmem>>, vector<128x128xbf16>
    %cst_13 = arith.constant dense<0.000000e+00> : vector<128x256xf32>
    %14 = tpu.matmul %13, %2, %cst_13 {dimension_numbers = #tpu.dot_dimension_numbers<[1], [1], [0], [0], [0, 0, 1, 0], [], []>} : vector<128x128xbf16>, vector<256x128xbf16>, vector<128x256xf32> -> vector<128x256xf32>
    %c0_14 = arith.constant 0 : index
    %c0_15 = arith.constant 0 : index
    %15 = vector.load %arg8[%c0_14, %c0_15] : memref<128x1xf32, #tpu.memory_space<vmem>>, vector<128x1xf32>
    %16 = vector.broadcast %15 : vector<128x1xf32> to vector<128x256xf32>
    %17 = arith.addf %14, %16 : vector<128x256xf32>
    %18 = vector.shape_cast %12 : vector<128x256xf32> to vector<4x32x256xf32>
    %19 = arith.truncf %18 : vector<4x32x256xf32> to vector<4x32x256xbf16>
    %c0_16 = arith.constant 0 : index
    %c0_17 = arith.constant 0 : index
    %c0_18 = arith.constant 0 : index
    %c0_19 = arith.constant 0 : index
    %20 = vector.load %arg10[%c0_16, %c0_17, %c0_18, %c0_19] : memref<1x4x32x256xbf16, #tpu.memory_space<vmem>>, vector<1x4x32x256xbf16>
    %21 = vector.shape_cast %20 : vector<1x4x32x256xbf16> to vector<4x32x256xbf16>
    %22 = vector.shape_cast %19 : vector<4x32x256xbf16> to vector<1x4x32x256xbf16>
    tpu.vector_store %arg10[%c0_16, %c0_17, %c0_18, %c0_19], %22 {strides = array<i32>} : memref<1x4x32x256xbf16, #tpu.memory_space<vmem>>, vector<1x4x32x256xbf16>,
    %23 = vector.shape_cast %17 : vector<128x256xf32> to vector<4x32x256xf32>
    %24 = arith.truncf %23 : vector<4x32x256xf32> to vector<4x32x256xbf16>
    %c0_20 = arith.constant 0 : index
    %c0_21 = arith.constant 0 : index
    %c0_22 = arith.constant 0 : index
    %c0_23 = arith.constant 0 : index
    %25 = vector.load %arg11[%c0_20, %c0_21, %c0_22, %c0_23] : memref<1x4x32x256xbf16, #tpu.memory_space<vmem>>, vector<1x4x32x256xbf16>
    %26 = vector.shape_cast %25 : vector<1x4x32x256xbf16> to vector<4x32x256xbf16>
    %27 = vector.shape_cast %24 : vector<4x32x256xbf16> to vector<1x4x32x256xbf16>
    tpu.vector_store %arg11[%c0_20, %c0_21, %c0_22, %c0_23], %27 {strides = array<i32>} : memref<1x4x32x256xbf16, #tpu.memory_space<vmem>>, vector<1x4x32x256xbf16>,
    %28 = vector.shape_cast %7 : vector<128x256xf32> to vector<4x32x256xf32>
    %29 = tpu.transpose %28, [0, 2, 1] : vector<4x32x256xf32> -> vector<4x256x32xf32>
    %30 = arith.truncf %29 : vector<4x256x32xf32> to vector<4x256x32xbf16>
    %c0_24 = arith.constant 0 : index
    %c0_25 = arith.constant 0 : index
    %c0_26 = arith.constant 0 : index
    %c0_27 = arith.constant 0 : index
    %31 = vector.load %arg9[%c0_24, %c0_25, %c0_26, %c0_27] : memref<1x4x256x32xbf16, #tpu.memory_space<vmem>>, vector<1x4x256x32xbf16>
    %32 = vector.shape_cast %31 : vector<1x4x256x32xbf16> to vector<4x256x32xbf16>
    %33 = vector.shape_cast %30 : vector<4x256x32xbf16> to vector<1x4x256x32xbf16>
    tpu.vector_store %arg9[%c0_24, %c0_25, %c0_26, %c0_27], %33 {strides = array<i32>} : memref<1x4x256x32xbf16, #tpu.memory_space<vmem>>, vector<1x4x256x32xbf16>,
    return
  }
  func.func @transform_0(%arg0: i32, %arg1: i32) -> (i32, i32, i32) {
    %c0_i32 = arith.constant 0 : i32
    %c0_i32_0 = arith.constant 0 : i32
    return %arg0, %arg1, %c0_i32 : i32, i32, i32
  }
  func.func @transform_1(%arg0: i32, %arg1: i32) -> (i32, i32) {
    %c0_i32 = arith.constant 0 : i32
    %c0_i32_0 = arith.constant 0 : i32
    %c0_i32_1 = arith.constant 0 : i32
    return %c0_i32, %c0_i32_0 : i32, i32
  }
  func.func @transform_2(%arg0: i32, %arg1: i32) -> (i32, i32) {
    %c0_i32 = arith.constant 0 : i32
    %c0_i32_0 = arith.constant 0 : i32
    %c0_i32_1 = arith.constant 0 : i32
    return %c0_i32, %c0_i32_0 : i32, i32
  }
  func.func @transform_3(%arg0: i32, %arg1: i32) -> (i32, i32) {
    %c0_i32 = arith.constant 0 : i32
    %c0_i32_0 = arith.constant 0 : i32
    %c0_i32_1 = arith.constant 0 : i32
    return %c0_i32, %c0_i32_0 : i32, i32
  }
  func.func @transform_4(%arg0: i32, %arg1: i32) -> (i32, i32) {
    %c0_i32 = arith.constant 0 : i32
    %c0_i32_0 = arith.constant 0 : i32
    %c0_i32_1 = arith.constant 0 : i32
    return %c0_i32, %c0_i32_0 : i32, i32
  }
  func.func @transform_5(%arg0: i32, %arg1: i32) -> (i32, i32) {
    %c0_i32 = arith.constant 0 : i32
    %c0_i32_0 = arith.constant 0 : i32
    %c0_i32_1 = arith.constant 0 : i32
    return %c0_i32, %c0_i32_0 : i32, i32
  }
  func.func @transform_6(%arg0: i32, %arg1: i32) -> (i32, i32) {
    %c0_i32 = arith.constant 0 : i32
    %c0_i32_0 = arith.constant 0 : i32
    %c0_i32_1 = arith.constant 0 : i32
    return %c0_i32, %c0_i32_0 : i32, i32
  }
  func.func @transform_7(%arg0: i32, %arg1: i32) -> (i32, i32, i32, i32) {
    %c0_i32 = arith.constant 0 : i32
    %c0_i32_0 = arith.constant 0 : i32
    %c0_i32_1 = arith.constant 0 : i32
    return %arg0, %c0_i32, %arg1, %c0_i32_0 : i32, i32, i32, i32
  }
  func.func @transform_8(%arg0: i32, %arg1: i32) -> (i32, i32, i32, i32) {
    %c0_i32 = arith.constant 0 : i32
    %c0_i32_0 = arith.constant 0 : i32
    %c0_i32_1 = arith.constant 0 : i32
    return %arg0, %c0_i32, %c0_i32_0, %arg1 : i32, i32, i32, i32
  }
  func.func @transform_9(%arg0: i32, %arg1: i32) -> (i32, i32, i32, i32) {
    %c0_i32 = arith.constant 0 : i32
    %c0_i32_0 = arith.constant 0 : i32
    %c0_i32_1 = arith.constant 0 : i32
    return %arg0, %c0_i32, %c0_i32_0, %arg1 : i32, i32, i32, i32
  }
}

</mosaic_0001>

<bundles_post_ra>
// kernel: tpu_custom_call.1
= control target key start
LH: loop header
LB: loop body
LE: loop exit
PB: predicated region body
PF: predicated region fallthrough
CT: control target
= control target key end

     0   :  { %s4824_s0 = inlined_call_operand.hbm [shape: f32[2,256,128], index: 0, kind: input, shape index: {}]   ;;  %s4825_s1 = inlined_call_operand.vmem [shape: bf16[128,128], index: 1, kind: input, shape index: {}]   ;;  %s4826_s2 = inlined_call_operand.vmem [shape: bf16[128,128], index: 2, kind: input, shape index: {}]   ;;  %s4827_s3 = inlined_call_operand.vmem [shape: bf16[128,128], index: 3, kind: input, shape index: {}]   ;;  %s4828_s4 = inlined_call_operand.vmem [shape: f32[128,1], index: 4, kind: input, shape index: {}]   ;;  %s4829_s5 = inlined_call_operand.vmem [shape: f32[128,1], index: 5, kind: input, shape index: {}]   ;;  %s4830_s6 = inlined_call_operand.vmem [shape: f32[128,1], index: 6, kind: input, shape index: {}]   ;;  %s4831_s7 = inlined_call_operand.vmem [shape: bf16[2,4,256,32], index: 7, kind: output, shape index: {0}]   ;;  %s4832_s8 = inlined_call_operand.hbm [shape: bf16[2,4,32,256], index: 8, kind: output, shape index: {1}]   ;;  %s4833_s9 = inlined_call_operand.hbm [shape: bf16[2,4,32,256], index: 9, kind: output, shape index: {2}]  }
   0x1   :  { %4837 = sst [smem:[#allocation12_spill]] %s4824_s0 }
   0x2   :  { %15 = vsyncpa [#allocation3], 0 }
   0x3   :  { %17 = vsyncpa [#allocation3 + $0x1], 0 }
   0x4   :  { %18 = vsyncpa [#allocation4], 0 }
   0x5   :  { %20 = vsyncpa [#allocation4 + $0x1], 0 }
   0x6   :  { %21 = vsyncpa [#allocation7], 0 }
   0x7   :  { %23 = vsyncpa [#allocation7 + $0x1], 0  ;;  %s3744_s30 = smov 0   ;;  %s3746_s10 = smov 0  }
   0x8   :  { %s3748_s11 = smov 0   ;;  %s3750_s12 = smov 0  }
   0x9   :  { %s3752_s13 = smov 0   ;;  %s3754_s14 = smov 0  }
   0xa LB: > { %s2608_s15 = sadd.s32 4294967295, %s3684_s14   ;;  %s2609_s16 = sadd.s32 4294967294, %s3684_s14   ;;  %s3684_s14 = sphi %s3754_s14, %s29_s14   ;;  %s3680_s13 = sphi %s3752_s13, %s4857_s13   ;;  %s3676_s12 = sphi %s3750_s12, %s4856_s12   ;;  %s3672_s11 = sphi %s3748_s11, %s4855_s11   ;;  %s3668_s10 = sphi %s3746_s10, %s4854_s10   ;;  %s3664_s30 = sphi %s3744_s30, %s4853_s30  }
   0xb   : > { %s41_s17 = sadd.s32 1, %s3680_s13  ;;  %s50_s18 = sadd.s32 1, %s3672_s11 }
   0xc   : > { %p43_p0 = scmp.ge.s32.totalorder %s41_s17, 2  ;;  %p57_p1 = scmp.ne.s32.totalorder %s3672_s11, %s3668_s10 }
   0xd   : > { %p58_p2 = scmp.eq.s32.totalorder %s3684_s14, 0  ;;  %p63_p3 = scmp.ne.s32.totalorder %s3668_s10, %s3664_s30 }
   0xe   : > { %s4859_s17 = smov (%p43_p0, %s41_s17), 0  ;;  %p64_p5 = scmp.eq.s32.totalorder %s2608_s15, 0 }
   0xf   : > { %4838 = sst [smem:[#allocation11_spill]] %s4859_s17  ;;  %p3785_p4 = por %p58_p2, %p57_p1 }
  0x10   : > { %s45_s20 = ssub.s32 %s3680_s13, %s4859_s17  ;;  %p243_p6 = scmp.eq.s32.totalorder %s2608_s15, 1 }
  0x11   : > { %p48_p7 = scmp.eq.s32.totalorder %s45_s20, 0  ;;  %p3791_p8 = por %p64_p5, %p63_p3 }
  0x12   : > { %p3795_p9 = por %p243_p6, %p57_p1  ;;  %p249_p10 = scmp.eq.s32.totalorder %s2609_s16, 1 }
  0x13   : > { %s3800_s23 = scalar_select %p48_p7, %s3672_s11, %s50_s18  }
  0x14   : > { %s4841_s22 = scalar_select %p3795_p9, 1, 0 }
  0x15   : > { %p3802_p11 = por %p249_p10, %p63_p3  ;;  %p3106_p13 = scmp.lt.s32.totalorder %s3684_s14, 2 }
  0x16   : > { %s315_s25 = sand.u32 1, %s3672_s11   ;;  %s2813_s27 = sshll.u32 %s3680_s13, 12 }
  0x17   : > { %s4842_s24 = scalar_select %p3802_p11, 1, 0 }
  0x18   : > { %s2612_s26 = sshll.u32 %s315_s25, 8  ;;  %s4843_s0 = sld [smem:[#allocation12_spill]] }
  0x19   : > { %s319_s16 = scalar_lea.vmem [#allocation2], %s2612_s26  ;;  %p3819_p0 = pnand %p3106_p13, %p3785_p4 }
  0x1a   : > { %s328_s18 = sshll.u32 %s319_s16, 4  ;;  %s3824_s17 = scalar_lea.sflag [#allocation3], %s315_s25  ;;  %s3815_s18 = int_to_ptr.vmem [resolvable:$true] %s328_s18 }
  0x1b   : > { %p3542_p3 = pneg %p3819_p0 }
  0x1e   : > { %s3813_s15 = scalar_lea.hbm %s4843_s0, %s2813_s27  ;;  %s3545_s19 = scalar_lea.hbm %s4843_s0, 8192 }
  0x1f   : > { %s3540_s27 = scalar_lea.hbm %s3813_s15, 4096  ;;  %p3546_p4 = scmp.lt.u32.totalorder %s3813_s15, %s4843_s0 }
  0x20   : > { %p3541_p2 = scmp.ne.s32.totalorder %s3813_s15, %s3540_s27  ;;  %p3547_p7 = scmp.lt.u32.totalorder %s3545_s19, %s3540_s27 }
  0x21   : > { %p3549_p13 = scmp.lt.u32.totalorder %s3540_s27, %s3813_s15 }
  0x22   : > { %p3543_p5 = pnand %p3542_p3, %p3541_p2  ;;  %p3548_p10 = por %p3547_p7, %p3546_p4 }
  0x24   : > { %p3544_p6 = pneg %p3543_p5  ;;  %p3550_p12 = por %p3549_p13, %p3548_p10 }
  0x26   : > { %p3551_p1 = pnand %p3550_p12, %p3544_p6 }
  0x28   : > { %3554 = shalt.err (!%p3551_p1)
}
  0x29   : > { %s3555_s25 = scalar_lea.vmem %s3815_s18, 4096  ;;  %s3686_s26 = smov [#allocation2]  }
  0x2a   : > { %p3556_p2 = scmp.ne.s32.totalorder %s3815_s18, %s3555_s25  ;;  %s3560_s28 = sshll.u32 %s3686_s26, 4  ;;  %s3561_s28 = int_to_ptr.vmem [resolvable:$false] %s3560_s28 }
  0x2b   : > { %s3562_s29 = scalar_lea.vmem %s3561_s28, 8192  ;;  %p3563_p9 = scmp.lt.s32.totalorder %s3815_s18, %s3561_s28 }
  0x2c   : > { %p3558_p5 = pnand %p3556_p2, %p3542_p3  ;;  %p3564_p4 = scmp.lt.s32.totalorder %s3562_s29, %s3555_s25 }
  0x2e   : > { %p3559_p11 = pneg %p3558_p5  ;;  %p3565_p7 = por %p3564_p4, %p3563_p9 }
  0x30   : > { %p3566_p10 = pnand %p3565_p7, %p3559_p11 }
  0x32   : > { %3569 = shalt.err (!%p3566_p10)
}
  0x33   : > { %s3687_s27 = smov 128   ;;  %s3688_s19 = smov 8  }
  0x34   : > { %3098 = dma.hbm_to_vmem [thread:$0]  (!%p3819_p0), %s3813_s15, 4096, %s3815_s18, %s3824_s17, %s3687_s27, %s3687_s27, %s3688_s19  }
  0x35   : > { %p336_p12 = scmp.lt.s32.totalorder %s3684_s14, 3  ;;  %p4845_p1 = scmp.ge.s32.totalorder %s3684_s14, 1 }
  0x37   : > { %p337_p3 = pnand %p4845_p1, %p336_p12 }
  0x38   : > { %s3856_s16 = sand.u32 (!%p337_p3), 1, %s3668_s10  }
  0x39   : > { %340 = sbr.rel (%p337_p3) target bundleno = 656 (0x290), region = 48  ;;  %s2616_s25 = sshll.u32 (!%p337_p3), %s3856_s16, 8 }
  0x3a   : > { %s343_s26 = scalar_lea.sflag (!%p337_p3), [#allocation3], %s3856_s16  ;;  %s3860_s28 = scalar_lea.vmem (!%p337_p3), [#allocation2], %s2616_s25 }
  0x40   : > { %3651 = dma.done.wait (%p3791_p8), %s343_s26, 4096  }
  0x41   : > { %3653 = vsyncadd (%p3791_p8), %s343_s26, 4294963200  ;;  %v3689_v0 = vmov 0   ;;  %v425_v1 = vld [vmem:[%s3860_s28 + $0x80] sm:$0xff]  ;;  %v426_v2 = vld [vmem:[%s3860_s28 + $0x88] sm:$0xff]  ;;  %s2617_s29 = sshll.u32 %s3856_s16, 7  ;;  %p397_p8 = scmp.lt.s32.totalorder %s3676_s12, 1 }
  0x42   : > { %3162 = vset.pattern.permute.xlu0 %v3689_v0  ;;  %3163 = vset.pattern.permute.xlu1 %v3689_v0  ;;  %v409_v3 = vld [vmem:[%s3860_s28] sm:$0xff]  ;;  %v3869_v4 = vpack.c.bf16 %v426_v2, %v425_v1  ;;  %v410_v5 = vld [vmem:[%s3860_s28 + $0x8] sm:$0xff]  ;;  %v427_v6 = vld [vmem:[%s3860_s28 + $0x90] sm:$0xff]  ;;  %s4259_s27 = scalar_lea.vmem [#allocation5], %s2617_s29  ;;  %s4412_s19 = scalar_lea.vmem [#allocation6], %s2617_s29  ;;  %vm2268_vm0 = vcmask 257024  }
  0x43   : > { %v428_v7 = vld [vmem:[%s3860_s28 + $0x98] sm:$0xff]  ;;  %v3874_v8 = vpack.c.bf16 %v410_v5, %v409_v3  ;;  %v411_v10 = vld [vmem:[%s3860_s28 + $0x10] sm:$0xff]  ;;  %v429_v12 = vld [vmem:[%s3860_s28 + $0xa0] sm:$0xff]  ;;  %s398_s25 = scalar_select %p397_p8, %s3676_s12, 1 }
  0x44   : > { %v3876_v9 = vpack.c.bf16 %v428_v7, %v427_v6  ;;  %2977 = vmatprep.subr.bf16.mxu0 %v3869_v4  ;;  %3009 = vmatprep.subr.bf16.mxu1 %v3869_v4  ;;  %v412_v11 = vld [vmem:[%s3860_s28 + $0x18] sm:$0xff]  ;;  %v430_v13 = vld [vmem:[%s3860_s28 + $0xa8] sm:$0xff]  ;;  %v413_v16 = vld [vmem:[%s3860_s28 + $0x20] sm:$0xff]  ;;  %s2431_s18 = sshll.u32 %s4259_s27, 4  ;;  %p4846_p11 = scmp.ne.s32.totalorder %s4841_s22, 0  ;;  %s4495_s18 = int_to_ptr.vmem [resolvable:$true] %s2431_s18 }
  0x45   : > { %2978 = vmatpush3.bf16.xpose.msra.mxu0 %v3874_v8  ;;  %3010 = vmatpush3.bf16.xpose.msra.mxu1 %v3874_v8  ;;  %v3888_v14 = vpack.c.bf16 %v412_v11, %v411_v10  ;;  %v3890_v15 = vpack.c.bf16 %v430_v13, %v429_v12  ;;  %v414_v17 = vld [vmem:[%s3860_s28 + $0x28] sm:$0xff]  ;;  %v3897_v18 = vld [vmem:[%s4825_s1] sm:$0xff]   ;;  %v431_v21 = vld [vmem:[%s3860_s28 + $0xb0] sm:$0xff]  ;;  %s2814_s26 = sshll.u32 %s398_s25, 9  ;;  %s3690_s17 = smov [#allocation5]  }
  0x46   : > { %2979 = vmatprep.subr.bf16.mxu0 %v3876_v9  ;;  %3011 = vmatprep.subr.bf16.mxu1 %v3876_v9  ;;  %v3904_v19 = vld [vmem:[%s4826_s2] sm:$0xff]   ;;  %v475_v22 = vld [vmem:[%s4828_s4 + $0x10] sm:$0xff]  ;;  %v432_v23 = vld [vmem:[%s3860_s28 + $0xb8] sm:$0xff]  ;;  %v3918_v24 = vpack.c.bf16 %v414_v17, %v413_v16  ;;  %s4468_s15 = scalar_lea.vmem %s4831_s7, %s2814_s26  ;;  %s3570_s26 = scalar_lea.vmem %s4495_s18, 2048 }
  0x47   : > { %v473_v20 = vld [vmem:[%s4828_s4] sm:$0xff]  ;;  %2993 = vmatprep.mubr.bf16.mxu0 %v3897_v18  ;;  %3025 = vmatprep.mubr.bf16.mxu1 %v3904_v19  ;;  %v474_v25 = vld [vmem:[%s4828_s4 + $0x8] sm:$0xff]  ;;  %v476_v26 = vld [vmem:[%s4828_s4 + $0x18] sm:$0xff]  ;;  %v3926_v27 = vpack.c.bf16 %v432_v23, %v431_v21  ;;  %p3571_p9 = scmp.ne.s32.totalorder %s4495_s18, %s3570_s26  ;;  %s3574_s21 = sshll.u32 %s3690_s17, 4  ;;  %s3575_s21 = int_to_ptr.vmem [resolvable:$false] %s3574_s21 }
  0x48   : > { %491 = vperm.xlu0 %3162, %v473_v20   ;;  %501 = vperm.xlu1 %3163, %v475_v22   ;;  %v415_v28 = vld [vmem:[%s3860_s28 + $0x30] sm:$0xff]  ;;  %v477_v29 = vld [vmem:[%s4828_s4 + $0x20] sm:$0xff]  ;;  %v478_v30 = vld [vmem:[%s4828_s4 + $0x28] sm:$0xff]  ;;  %s3576_s20 = scalar_lea.vmem %s3575_s21, 4096  ;;  %p3577_p13 = scmp.lt.s32.totalorder %s4495_s18, %s3575_s21 }
  0x49   : > { %v416_v31 = vld [vmem:[%s3860_s28 + $0x38] sm:$0xff]  ;;  %v433_v32 = vld [vmem:[%s3860_s28 + $0xc0] sm:$0xff]  ;;  %v434_v33 = vld [vmem:[%s3860_s28 + $0xc8] sm:$0xff]  ;;  %p3572_p0 = pnand %p3571_p9, %p4846_p11  ;;  %p3578_p2 = scmp.lt.s32.totalorder %s3576_s20, %s3570_s26 }
  0x4a   : > { %v479_v34 = vld [vmem:[%s4828_s4 + $0x30] sm:$0xff]  ;;  %v3945_v35 = vpack.c.bf16 %v416_v31, %v415_v28  ;;  %v480_v36 = vld [vmem:[%s4828_s4 + $0x38] sm:$0xff]  ;;  %v3950_v37 = vpack.c.bf16 %v434_v33, %v433_v32  ;;  %v481_v38 = vld [vmem:[%s4828_s4 + $0x40] sm:$0xff] }
  0x4b   : > { %v482_v39 = vld [vmem:[%s4828_s4 + $0x48] sm:$0xff]  ;;  %v417_v40 = vld [vmem:[%s3860_s28 + $0x40] sm:$0xff]  ;;  %v435_v42 = vld [vmem:[%s3860_s28 + $0xd0] sm:$0xff]  ;;  %p3573_p6 = pneg %p3572_p0  ;;  %p3579_p5 = por %p3578_p2, %p3577_p13 }
  0x4c   : > { %496 = vperm.xlu0 %3162, %v474_v25   ;;  %506 = vperm.xlu1 %3163, %v476_v26   ;;  %v418_v41 = vld [vmem:[%s3860_s28 + $0x48] sm:$0xff]  ;;  %v436_v43 = vld [vmem:[%s3860_s28 + $0xd8] sm:$0xff]  ;;  %v483_v45 = vld [vmem:[%s4828_s4 + $0x50] sm:$0xff] }
  0x4d   : > { %2980 = vmatpush3.bf16.xpose.msra.mxu0 %v3888_v14  ;;  %3012 = vmatpush3.bf16.xpose.msra.mxu1 %v3888_v14  ;;  %v3966_v44 = vpack.c.bf16 %v418_v41, %v417_v40  ;;  %v484_v46 = vld [vmem:[%s4828_s4 + $0x58] sm:$0xff]  ;;  %v3974_v47 = vpack.c.bf16 %v436_v43, %v435_v42  ;;  %v419_v48 = vld [vmem:[%s3860_s28 + $0x50] sm:$0xff]  ;;  %v485_v50 = vld [vmem:[%s4828_s4 + $0x60] sm:$0xff]  ;;  %p3580_p4 = pnand %p3579_p5, %p3573_p6 }
  0x4e   : > { %2981 = vmatprep.subr.bf16.mxu0 %v3890_v15  ;;  %3013 = vmatprep.subr.bf16.mxu1 %v3890_v15  ;;  %v420_v49 = vld [vmem:[%s3860_s28 + $0x58] sm:$0xff]  ;;  %v486_v51 = vld [vmem:[%s4828_s4 + $0x68] sm:$0xff]  ;;  %v437_v52 = vld [vmem:[%s3860_s28 + $0xe0] sm:$0xff] }
  0x4f   : > { %v438_v53 = vld [vmem:[%s3860_s28 + $0xe8] sm:$0xff]  ;;  %v487_v54 = vld [vmem:[%s4828_s4 + $0x70] sm:$0xff]  ;;  %v3993_v55 = vpack.c.bf16 %v420_v49, %v419_v48  ;;  %v488_v56 = vld [vmem:[%s4828_s4 + $0x78] sm:$0xff] }
  0x50   : > { %511 = vperm.xlu0 %3162, %v477_v29   ;;  %516 = vperm.xlu1 %3163, %v478_v30   ;;  %v3998_v57 = vpack.c.bf16 %v438_v53, %v437_v52  ;;  %v746_v58 = vld [vmem:[%s4829_s5] sm:$0xff]  ;;  %v747_v59 = vld [vmem:[%s4829_s5 + $0x8] sm:$0xff]  ;;  %v439_v62 = vld [vmem:[%s3860_s28 + $0xf0] sm:$0xff] }
  0x51   : > { %v421_v60 = vld [vmem:[%s3860_s28 + $0x60] sm:$0xff]  ;;  %v422_v61 = vld [vmem:[%s3860_s28 + $0x68] sm:$0xff]  ;;  %v440_v63 = vld [vmem:[%s3860_s28 + $0xf8] sm:$0xff] }
  0x52   : > { %v748_v0 = vld [vmem:[%s4829_s5 + $0x10] sm:$0xff]  ;;  %v4017_v1 = vpack.c.bf16 %v422_v61, %v421_v60  ;;  %v749_v2 = vld [vmem:[%s4829_s5 + $0x18] sm:$0xff]  ;;  %v4022_v3 = vpack.c.bf16 %v440_v63, %v439_v62  ;;  %v750_v5 = vld [vmem:[%s4829_s5 + $0x20] sm:$0xff] }
  0x53   : > { %v751_v6 = vld [vmem:[%s4829_s5 + $0x28] sm:$0xff]  ;;  %v423_v7 = vld [vmem:[%s3860_s28 + $0x70] sm:$0xff]  ;;  %v424_v10 = vld [vmem:[%s3860_s28 + $0x78] sm:$0xff]  ;;  %s4836_s28 = sshll.u32 %s3676_s12, 11 }
  0x54   : > { %521 = vperm.xlu0 %3162, %v479_v34   ;;  %526 = vperm.xlu1 %3163, %v480_v36   ;;  %v4036_v11 = vpack.c.bf16 %v424_v10, %v423_v7  ;;  %v752_v12 = vld [vmem:[%s4829_s5 + $0x30] sm:$0xff]  ;;  %v753_v13 = vld [vmem:[%s4829_s5 + $0x38] sm:$0xff]  ;;  %v754_v16 = vld [vmem:[%s4829_s5 + $0x40] sm:$0xff]  ;;  %s4489_s25 = scalar_lea.hbm %s4832_s8, %s4836_s28 }
  0x55   : > { %2982 = vmatpush3.bf16.xpose.msra.mxu0 %v3918_v24  ;;  %3014 = vmatpush3.bf16.xpose.msra.mxu1 %v3918_v24  ;;  %v755_v17 = vld [vmem:[%s4829_s5 + $0x48] sm:$0xff]  ;;  %v757_v22 = vld [vmem:[%s4829_s5 + $0x58] sm:$0xff]  ;;  %v3525_v26 = vld [vmem:[%s4826_s2 + $0x20] sm:$0xff]  }
  0x56   : > { %2983 = vmatprep.subr.bf16.mxu0 %v3926_v27  ;;  %3015 = vmatprep.subr.bf16.mxu1 %v3926_v27  ;;  %v3518_v20 = vld [vmem:[%s4825_s1 + $0x8] sm:$0xff]   ;;  %v3523_v23 = vld [vmem:[%s4826_s2 + $0x18] sm:$0xff]   ;;  %v1021_v31 = vld [vmem:[%s4830_s6 + $0x10] sm:$0xff] }
  0x57   : > { %v3519_v21 = vld [vmem:[%s4826_s2 + $0x8] sm:$0xff]   ;;  %v761_v25 = vld [vmem:[%s4829_s5 + $0x78] sm:$0xff]  ;;  %v3528_v33 = vld [vmem:[%s4825_s1 + $0x30] sm:$0xff]  }
  0x58   : > { %531 = vperm.xlu0 %3162, %v481_v38   ;;  %536 = vperm.xlu1 %3163, %v482_v39   ;;  %v1020_v28 = vld [vmem:[%s4830_s6 + $0x8] sm:$0xff]  ;;  %v1022_v32 = vld [vmem:[%s4830_s6 + $0x18] sm:$0xff]  ;;  %v3529_v34 = vld [vmem:[%s4826_s2 + $0x30] sm:$0xff]  }
  0x59   : > { %v3526_v29 = vld [vmem:[%s4825_s1 + $0x28] sm:$0xff]   ;;  %v3531_v38 = vld [vmem:[%s4826_s2 + $0x38] sm:$0xff]   ;;  %v1025_v39 = vld [vmem:[%s4830_s6 + $0x30] sm:$0xff] }
  0x5a   : > { %v3527_v30 = vld [vmem:[%s4826_s2 + $0x28] sm:$0xff]   ;;  %v1026_v40 = vld [vmem:[%s4830_s6 + $0x38] sm:$0xff]  ;;  %v3532_v41 = vld [vmem:[%s4827_s3] sm:$0xff]  }
  0x5b   : > { %v1024_v36 = vld [vmem:[%s4830_s6 + $0x28] sm:$0xff]  ;;  %v3533_v42 = vld [vmem:[%s4827_s3 + $0x20] sm:$0xff]   ;;  %v1034_v52 = vld [vmem:[%s4830_s6 + $0x78] sm:$0xff] }
  0x5c   : > { %541 = vperm.xlu0 %3162, %v483_v45   ;;  %546 = vperm.xlu1 %3163, %v484_v46   ;;  %v1027_v43 = vld [vmem:[%s4830_s6 + $0x40] sm:$0xff]  ;;  %v1029_v45 = vld [vmem:[%s4830_s6 + $0x50] sm:$0xff]  ;;  %v1030_v46 = vld [vmem:[%s4830_s6 + $0x58] sm:$0xff] }
  0x5d   : > { %2984 = vmatpush3.bf16.xpose.msra.mxu0 %v3945_v35  ;;  %3016 = vmatpush3.bf16.xpose.msra.mxu1 %v3945_v35  ;;  %v3535_v48 = vld [vmem:[%s4827_s3 + $0x28] sm:$0xff]   ;;  %v1031_v49 = vld [vmem:[%s4830_s6 + $0x60] sm:$0xff]  ;;  %v3536_v53 = vld [vmem:[%s4827_s3 + $0x10] sm:$0xff]  }
  0x5e   : > { %2985 = vmatprep.subr.bf16.mxu0 %v3950_v37  ;;  %3017 = vmatprep.subr.bf16.mxu1 %v3950_v37 }
  0x60   : > { %551 = vperm.xlu0 %3162, %v485_v50   ;;  %556 = vperm.xlu1 %3163, %v486_v51   ;;  %v1032_v50 = vld [vmem:[%s4830_s6 + $0x68] sm:$0xff]  ;;  %v1033_v51 = vld [vmem:[%s4830_s6 + $0x70] sm:$0xff] }
  0x64   : > { %561 = vperm.xlu0 %3162, %v487_v54   ;;  %566 = vperm.xlu1 %3163, %v488_v56   ;;  %v3537_v54 = vld [vmem:[%s4827_s3 + $0x30] sm:$0xff]   ;;  %v3539_v56 = vld [vmem:[%s4827_s3 + $0x38] sm:$0xff]  }
  0x65   : > { %2986 = vmatpush3.bf16.xpose.msra.mxu0 %v3966_v44  ;;  %3018 = vmatpush3.bf16.xpose.msra.mxu1 %v3966_v44 }
  0x66   : > { %2987 = vmatprep.subr.bf16.mxu0 %v3974_v47  ;;  %3019 = vmatprep.subr.bf16.mxu1 %v3974_v47 }
  0x68   : > { %764 = vperm.xlu0 %3162, %v746_v58   ;;  %769 = vperm.xlu1 %3163, %v747_v59  }
  0x6c   : > { %774 = vperm.xlu0 %3162, %v748_v0   ;;  %779 = vperm.xlu1 %3163, %v749_v2  }
  0x6d   : > { %2988 = vmatpush3.bf16.xpose.msra.mxu0 %v3993_v55  ;;  %3020 = vmatpush3.bf16.xpose.msra.mxu1 %v3993_v55 }
  0x6e   : > { %2989 = vmatprep.subr.bf16.mxu0 %v3998_v57  ;;  %3021 = vmatprep.subr.bf16.mxu1 %v3998_v57 }
  0x70   : > { %784 = vperm.xlu0 %3162, %v750_v5   ;;  %789 = vperm.xlu1 %3163, %v751_v6  }
  0x74   : > { %794 = vperm.xlu0 %3162, %v752_v12   ;;  %799 = vperm.xlu1 %3163, %v753_v13  }
  0x75   : > { %2990 = vmatpush3.bf16.xpose.msra.mxu0 %v4017_v1  ;;  %3022 = vmatpush3.bf16.xpose.msra.mxu1 %v4017_v1 }
  0x76   : > { %2991 = vmatprep.subr.bf16.mxu0 %v4022_v3  ;;  %3023 = vmatprep.subr.bf16.mxu1 %v4022_v3 }
  0x78   : > { %804 = vperm.xlu0 %3162, %v754_v16   ;;  %809 = vperm.xlu1 %3163, %v755_v17  }
  0x7c   : > { %819 = vperm.xlu1 %3163, %v757_v22  }
  0x7d   : > { %2992 = vmatpush3.bf16.xpose.msra.mxu0 %v4036_v11  ;;  %3024 = vmatpush3.bf16.xpose.msra.mxu1 %v4036_v11 }
  0x7e   : > { %3041 = vmatprep.subr.bf16.mxu0 %v3869_v4  ;;  %3073 = vmatprep.subr.bf16.mxu1 %v3869_v4  ;;  %v756_v4 = vld [vmem:[%s4829_s5 + $0x50] sm:$0xff] }
  0x7f   : > { %814 = vperm.xlu0 %3162, %v756_v4  }
  0x84   : > { %2994 = vmatmul.mubr.bf16.vlgmr.msra.gmra.mrb[0].mxu0 %v3897_v18  ;;  %3026 = vmatmul.mubr.bf16.vlgmr.msra.gmra.mrb[0].mxu1 %v3904_v19  ;;  %v3521_v18 = vld [vmem:[%s4826_s2 + $0x10] sm:$0xff]   ;;  %v759_v19 = vld [vmem:[%s4829_s5 + $0x68] sm:$0xff] }
  0x85   : > { %3042 = vmatpush3.bf16.xpose.msra.mxu0 %v3874_v8  ;;  %3081 = vmatpush3.bf16.xpose.msra.mxu1 %v3874_v8  ;;  %v3520_v8 = vld [vmem:[%s4825_s1 + $0x10] sm:$0xff]  }
  0x86   : > { %2995 = vmatprep.mubr.bf16.mxu0 %v3518_v20  ;;  %3027 = vmatprep.mubr.bf16.mxu1 %v3519_v21 }
  0x87   : > { %3043 = vmatprep.subr.bf16.mxu0 %v3876_v9  ;;  %3074 = vmatprep.subr.bf16.mxu1 %v3876_v9  ;;  %v758_v9 = vld [vmem:[%s4829_s5 + $0x60] sm:$0xff] }
  0x88   : > { %824 = vperm.xlu0 %3162, %v758_v9   ;;  %829 = vperm.xlu1 %3163, %v759_v19  }
  0x8c   : > { %2996 = vmatmul.mubr.bf16.gmra.mrb[4].mxu0 %v3518_v20  ;;  %3028 = vmatmul.mubr.bf16.gmra.mrb[4].mxu1 %v3519_v21 }
  0x8d   : > { %3044 = vmatpush3.bf16.xpose.msra.mxu0 %v3888_v14  ;;  %3082 = vmatpush3.bf16.xpose.msra.mxu1 %v3888_v14  ;;  %v3522_v14 = vld [vmem:[%s4825_s1 + $0x18] sm:$0xff]  }
  0x8e   : > { %2997 = vmatprep.mubr.bf16.mxu0 %v3520_v8  ;;  %3029 = vmatprep.mubr.bf16.mxu1 %v3521_v18 }
  0x8f   : > { %3045 = vmatprep.subr.bf16.mxu0 %v3890_v15  ;;  %3075 = vmatprep.subr.bf16.mxu1 %v3890_v15  ;;  %v760_v15 = vld [vmem:[%s4829_s5 + $0x70] sm:$0xff] }
  0x90   : > { %834 = vperm.xlu0 %3162, %v760_v15   ;;  %839 = vperm.xlu1 %3163, %v761_v25  }
  0x94   : > { %2998 = vmatmul.mubr.bf16.gmra.mrb[8].mxu0 %v3520_v8  ;;  %3030 = vmatmul.mubr.bf16.gmra.mrb[8].mxu1 %v3521_v18 }
  0x95   : > { %3046 = vmatpush3.bf16.xpose.msra.mxu0 %v3918_v24  ;;  %3083 = vmatpush3.bf16.xpose.msra.mxu1 %v3918_v24  ;;  %v3524_v24 = vld [vmem:[%s4825_s1 + $0x20] sm:$0xff]  }
  0x96   : > { %2999 = vmatprep.mubr.bf16.mxu0 %v3522_v14  ;;  %3031 = vmatprep.mubr.bf16.mxu1 %v3523_v23 }
  0x97   : > { %3047 = vmatprep.subr.bf16.mxu0 %v3926_v27  ;;  %3076 = vmatprep.subr.bf16.mxu1 %v3926_v27  ;;  %v1019_v27 = vld [vmem:[%s4830_s6] sm:$0xff] }
  0x98   : > { %1037 = vperm.xlu0 %3162, %v1019_v27   ;;  %1042 = vperm.xlu1 %3163, %v1020_v28  }
  0x9c   : > { %3000 = vmatmul.mubr.bf16.gmra.mrb[12].mxu0 %v3522_v14  ;;  %3032 = vmatmul.mubr.bf16.gmra.mrb[12].mxu1 %v3523_v23 }
  0x9d   : > { %3048 = vmatpush3.bf16.xpose.msra.mxu0 %v3945_v35  ;;  %3084 = vmatpush3.bf16.xpose.msra.mxu1 %v3945_v35  ;;  %v1023_v35 = vld [vmem:[%s4830_s6 + $0x20] sm:$0xff] }
  0x9e   : > { %3001 = vmatprep.mubr.bf16.mxu0 %v3524_v24  ;;  %3033 = vmatprep.mubr.bf16.mxu1 %v3525_v26 }
  0x9f   : > { %3049 = vmatprep.subr.bf16.mxu0 %v3950_v37  ;;  %3077 = vmatprep.subr.bf16.mxu1 %v3950_v37  ;;  %v3530_v37 = vld [vmem:[%s4825_s1 + $0x38] sm:$0xff]  }
  0xa0   : > { %1047 = vperm.xlu0 %3162, %v1021_v31   ;;  %1052 = vperm.xlu1 %3163, %v1022_v32  }
  0xa4   : > { %3002 = vmatmul.mubr.bf16.gmra.mrb[16].mxu0 %v3524_v24  ;;  %3034 = vmatmul.mubr.bf16.gmra.mrb[16].mxu1 %v3525_v26 }
  0xa5   : > { %3050 = vmatpush3.bf16.xpose.msra.mxu0 %v3966_v44  ;;  %3085 = vmatpush3.bf16.xpose.msra.mxu1 %v3966_v44  ;;  %v1028_v44 = vld [vmem:[%s4830_s6 + $0x48] sm:$0xff] }
  0xa6   : > { %3003 = vmatprep.mubr.bf16.mxu0 %v3526_v29  ;;  %3035 = vmatprep.mubr.bf16.mxu1 %v3527_v30 }
  0xa7   : > { %3051 = vmatprep.subr.bf16.mxu0 %v3974_v47  ;;  %3078 = vmatprep.subr.bf16.mxu1 %v3974_v47  ;;  %v3534_v47 = vld [vmem:[%s4827_s3 + $0x8] sm:$0xff]  }
  0xa8   : > { %1057 = vperm.xlu0 %3162, %v1023_v35   ;;  %1062 = vperm.xlu1 %3163, %v1024_v36  }
  0xac   : > { %3004 = vmatmul.mubr.bf16.gmra.mrb[20].mxu0 %v3526_v29  ;;  %3036 = vmatmul.mubr.bf16.gmra.mrb[20].mxu1 %v3527_v30 }
  0xad   : > { %3052 = vmatpush3.bf16.xpose.msra.mxu0 %v3993_v55  ;;  %3086 = vmatpush3.bf16.xpose.msra.mxu1 %v3993_v55  ;;  %v3538_v55 = vld [vmem:[%s4827_s3 + $0x18] sm:$0xff]  }
  0xae   : > { %3005 = vmatprep.mubr.bf16.mxu0 %v3528_v33  ;;  %3037 = vmatprep.mubr.bf16.mxu1 %v3529_v34 }
  0xaf   : > { %3053 = vmatprep.subr.bf16.mxu0 %v3998_v57  ;;  %3079 = vmatprep.subr.bf16.mxu1 %v3998_v57 }
  0xb0   : > { %1067 = vperm.xlu0 %3162, %v1025_v39   ;;  %1072 = vperm.xlu1 %3163, %v1026_v40  }
  0xb4   : > { %3006 = vmatmul.mubr.bf16.gmra.mrb[24].mxu0 %v3528_v33  ;;  %3038 = vmatmul.mubr.bf16.gmra.mrb[24].mxu1 %v3529_v34 }
  0xb5   : > { %3054 = vmatpush3.bf16.xpose.msra.mxu0 %v4017_v1  ;;  %3087 = vmatpush3.bf16.xpose.msra.mxu1 %v4017_v1 }
  0xb6   : > { %3007 = vmatprep.mubr.bf16.mxu0 %v3530_v37  ;;  %3039 = vmatprep.mubr.bf16.mxu1 %v3531_v38 }
  0xb7   : > { %3055 = vmatprep.subr.bf16.mxu0 %v4022_v3  ;;  %3080 = vmatprep.subr.bf16.mxu1 %v4022_v3 }
  0xb8   : > { %1077 = vperm.xlu0 %3162, %v1027_v43   ;;  %1082 = vperm.xlu1 %3163, %v1028_v44  }
  0xbc   : > { %3008 = vmatmul.mubr.bf16.gmra.mrb[28].mxu0 %v3530_v37  ;;  %3040 = vmatmul.mubr.bf16.gmra.mrb[28].mxu1 %v3531_v38 }
  0xbd   : > { %3056 = vmatpush3.bf16.xpose.msra.mxu0 %v4036_v11  ;;  %3088 = vmatpush3.bf16.xpose.msra.mxu1 %v4036_v11 }
  0xbe   : > { %3057 = vmatprep.mubr.bf16.mxu0 %v3532_v41  ;;  %3065 = vmatprep.mubr.bf16.mxu1 %v3533_v42 }
  0xbf   : > { %1087 = vperm.xlu0 %3162, %v1029_v45   ;;  %1092 = vperm.xlu1 %3163, %v1030_v46  }
  0xc3   : > { %1097 = vperm.xlu0 %3162, %v1031_v49   ;;  %1102 = vperm.xlu1 %3163, %v1032_v50  }
  0xc4   : > { %3058 = vmatmul.mubr.bf16.vlgmr.msra.gmra.mrb[32].mxu0 %v3532_v41  ;;  %3066 = vmatmul.mubr.bf16.vlgmr.msra.gmra.mrb[32].mxu1 %v3533_v42 }
  0xc5   : > { %3059 = vmatprep.mubr.bf16.mxu0 %v3534_v47  ;;  %3067 = vmatprep.mubr.bf16.mxu1 %v3535_v48 }
  0xc7   : > { %1107 = vperm.xlu0 %3162, %v1033_v51   ;;  %1112 = vperm.xlu1 %3163, %v1034_v52   ;;  %v492_v57 = vpop.permute.xlu0 %491  ;;  %v502_v58 = vpop.permute.xlu1 %501 }
  0xcb   : > { %v497_v59 = vpop.permute.xlu0 %496  ;;  %v4218_v60 = vpop.permute.xlu1 %506 }
  0xcc   : > { %3060 = vmatmul.mubr.bf16.gmra.mrb[36].mxu0 %v3534_v47  ;;  %3068 = vmatmul.mubr.bf16.gmra.mrb[36].mxu1 %v3535_v48 }
  0xcd   : > { %3061 = vmatprep.mubr.bf16.mxu0 %v3536_v53  ;;  %3069 = vmatprep.mubr.bf16.mxu1 %v3537_v54 }
  0xcf   : > { %v4220_v61 = vpop.permute.xlu0 %511  ;;  %v4222_v62 = vpop.permute.xlu1 %516 }
  0xd3   : > { %v4224_v63 = vpop.permute.xlu0 %521  ;;  %v4226_v0 = vpop.permute.xlu1 %526 }
  0xd4   : > { %3062 = vmatmul.mubr.bf16.gmra.mrb[40].mxu0 %v3536_v53  ;;  %3070 = vmatmul.mubr.bf16.gmra.mrb[40].mxu1 %v3537_v54 }
  0xd5   : > { %3063 = vmatprep.mubr.bf16.mxu0 %v3538_v55  ;;  %3071 = vmatprep.mubr.bf16.mxu1 %v3539_v56 }
  0xd7   : > { %v4228_v1 = vpop.permute.xlu0 %531  ;;  %v4230_v2 = vpop.permute.xlu1 %536 }
  0xdb   : > { %v4232_v3 = vpop.permute.xlu0 %541  ;;  %v4234_v5 = vpop.permute.xlu1 %546 }
  0xdc   : > { %3064 = vmatmul.mubr.bf16.gmra.mrb[44].mxu0 %v3538_v55  ;;  %3072 = vmatmul.mubr.bf16.gmra.mrb[44].mxu1 %v3539_v56 }
  0xdf   : > { %v4236_v6 = vpop.permute.xlu0 %551  ;;  %v4238_v7 = vpop.permute.xlu1 %556 }
  0xe3   : > { %v4240_v10 = vpop.permute.xlu0 %561  ;;  %v4242_v11 = vpop.permute.xlu1 %566 }
  0xe7   : > { %v765_v12 = vpop.permute.xlu0 %764  ;;  %v770_v13 = vpop.permute.xlu1 %769 }
  0xeb   : > { %v775_v16 = vpop.permute.xlu0 %774  ;;  %v780_v17 = vpop.permute.xlu1 %779 }
  0xef   : > { %v4244_v20 = vpop.permute.xlu0 %784  ;;  %v4246_v21 = vpop.permute.xlu1 %789 }
  0xf3   : > { %v4248_v4 = vpop.permute.xlu0 %794  ;;  %v4250_v22 = vpop.permute.xlu1 %799 }
  0xf7   : > { %v4252_v8 = vpop.permute.xlu0 %804  ;;  %v4254_v18 = vpop.permute.xlu1 %809 }
  0xfb   : > { %v4264_v40 = vpop.permute.xlu1 %819 }
  0xfe   : > { %v4262_v39 = vpop.permute.xlu0 %814 }
 0x157   : > { %v651_v9 = vpop.f32.mrb[0].mxu0  ;;  %v924_v19 = vpop.f32.mrb[0].mxu1 }
 0x158   : > { %v652_v14 = vadd.f32 %v651_v9, %v492_v57  ;;  %v653_v23 = vpop.f32.mrb[1].mxu0  ;;  %v925_v15 = vadd.f32 %v924_v19, %v765_v12  ;;  %v926_v25 = vpop.f32.mrb[1].mxu1 }
 0x159   : > { %v654_v24 = vadd.f32 %v653_v23, %v492_v57  ;;  %v655_v26 = vpop.f32.mrb[2].mxu0  ;;  %v927_v27 = vadd.f32 %v926_v25, %v765_v12  ;;  %v928_v28 = vpop.f32.mrb[2].mxu1 }
 0x15a   : > { %v656_v29 = vadd.f32 %v655_v26, %v497_v59  ;;  %v657_v30 = vpop.f32.mrb[3].mxu0  ;;  %v929_v31 = vadd.f32 %v928_v28, %v770_v13  ;;  %v930_v32 = vpop.f32.mrb[3].mxu1 }
 0x15b   : > { %v3164_v33 = vpack.i.bf16 %v654_v24, %v652_v14  ;;  %v658_v34 = vadd.f32 %v657_v30, %v497_v59  ;;  %v2815_v35 = vpack.c.bf16 %v927_v27, %v925_v15  ;;  %v931_v36 = vadd.f32 %v930_v32, %v770_v13 }
 0x15d   : > { %v3166_v37 = vpack.i.bf16 %v658_v34, %v656_v29  ;;  %1372 = vst [vmem:[%s4259_s27] sm:$0xff] %v2815_v35  ;;  %3165 = vxpose.xlu0.b32.start [1/4] (short) %v3164_v33, 128  ;;  %v2816_v38 = vpack.c.bf16 %v931_v36, %v929_v31 }
 0x15f   : > { %1373 = vst [vmem:[%s4259_s27 + $0x8] sm:$0xff] %v2816_v38  ;;  %v661_v41 = vpop.f32.mrb[4].mxu0  ;;  %v934_v42 = vpop.f32.mrb[4].mxu1 }
 0x160   : > { %v662_v43 = vadd.f32 %v661_v41, %v502_v58  ;;  %v935_v44 = vadd.f32 %v934_v42, %v775_v16  ;;  %v663_v45 = vpop.f32.mrb[5].mxu0  ;;  %v936_v46 = vpop.f32.mrb[5].mxu1 }
 0x161   : > { %v664_v47 = vadd.f32 %v663_v45, %v502_v58  ;;  %v937_v48 = vadd.f32 %v936_v46, %v775_v16  ;;  %v665_v49 = vpop.f32.mrb[6].mxu0  ;;  %3167 = vxpose.xlu0.b32.cont [2/4] (short) %v3166_v37, 128  ;;  %v938_v50 = vpop.f32.mrb[6].mxu1 }
 0x162   : > { %v666_v51 = vadd.f32 %v665_v49, %v4218_v60  ;;  %v667_v52 = vpop.f32.mrb[7].mxu0  ;;  %v939_v53 = vadd.f32 %v938_v50, %v780_v17  ;;  %v940_v54 = vpop.f32.mrb[7].mxu1 }
 0x163   : > { %v3168_v55 = vpack.i.bf16 %v664_v47, %v662_v43  ;;  %v2817_v56 = vpack.c.bf16 %v937_v48, %v935_v44  ;;  %v668_v57 = vadd.f32 %v667_v52, %v4218_v60  ;;  %v941_v59 = vadd.f32 %v940_v54, %v780_v17  ;;  %v4270_v58 = vpop.permute.xlu0 %824  ;;  %v4272_v16 = vpop.permute.xlu1 %829 }
 0x165   : > { %1374 = vst [vmem:[%s4259_s27 + $0x10] sm:$0xff] %v2817_v56  ;;  %v3170_v12 = vpack.i.bf16 %v668_v57, %v666_v51  ;;  %v2818_v13 = vpack.c.bf16 %v941_v59, %v939_v53  ;;  %3169 = vxpose.xlu0.b32.cont [3/4] (short) %v3168_v55, 128 }
 0x167   : > { %1375 = vst [vmem:[%s4259_s27 + $0x18] sm:$0xff] %v2818_v13  ;;  %v671_v9 = vpop.f32.mrb[8].mxu0  ;;  %v944_v19 = vpop.f32.mrb[8].mxu1 }
 0x168   : > { %v672_v14 = vadd.f32 %v671_v9, %v4220_v61  ;;  %v945_v23 = vadd.f32 %v944_v19, %v4244_v20  ;;  %v673_v15 = vpop.f32.mrb[9].mxu0  ;;  %v946_v25 = vpop.f32.mrb[9].mxu1 }
 0x169   : > { %v674_v60 = vadd.f32 %v673_v15, %v4220_v61  ;;  %v947_v17 = vadd.f32 %v946_v25, %v4244_v20  ;;  %v675_v24 = vpop.f32.mrb[10].mxu0  ;;  %v948_v26 = vpop.f32.mrb[10].mxu1  ;;  %3171 = vxpose.xlu0.b32.end [4/4] (short) %v3170_v12, 128 }
 0x16a   : > { %v676_v27 = vadd.f32 %v675_v24, %v4222_v62  ;;  %v949_v28 = vadd.f32 %v948_v26, %v4246_v21  ;;  %v677_v29 = vpop.f32.mrb[11].mxu0  ;;  %v950_v30 = vpop.f32.mrb[11].mxu1 }
 0x16b   : > { %v3252_v31 = vpack.i.bf16 %v674_v60, %v672_v14  ;;  %v2819_v32 = vpack.c.bf16 %v947_v17, %v945_v23  ;;  %v678_v33 = vadd.f32 %v677_v29, %v4222_v62  ;;  %v951_v34 = vadd.f32 %v950_v30, %v4246_v21  ;;  %v4284_v20 = vpop.permute.xlu0 %834  ;;  %v4286_v36 = vpop.permute.xlu1 %839 }
 0x16d   : > { %1376 = vst [vmem:[%s4259_s27 + $0x20] sm:$0xff] %v2819_v32  ;;  %v3254_v61 = vpack.i.bf16 %v678_v33, %v676_v27  ;;  %v2820_v35 = vpack.c.bf16 %v951_v34, %v949_v28  ;;  %3253 = vxpose.xlu1.b32.start [1/4] (short) %v3252_v31, 128 }
 0x16f   : > { %1377 = vst [vmem:[%s4259_s27 + $0x28] sm:$0xff] %v2820_v35  ;;  %v681_v37 = vpop.f32.mrb[12].mxu0  ;;  %v954_v38 = vpop.f32.mrb[12].mxu1 }
 0x170   : > { %v682_v41 = vadd.f32 %v681_v37, %v4224_v63  ;;  %v955_v42 = vadd.f32 %v954_v38, %v4248_v4  ;;  %v683_v43 = vpop.f32.mrb[13].mxu0  ;;  %v956_v62 = vpop.f32.mrb[13].mxu1 }
 0x171   : > { %v684_v21 = vadd.f32 %v683_v43, %v4224_v63  ;;  %v957_v44 = vadd.f32 %v956_v62, %v4248_v4  ;;  %v685_v45 = vpop.f32.mrb[14].mxu0  ;;  %v958_v46 = vpop.f32.mrb[14].mxu1  ;;  %3255 = vxpose.xlu1.b32.cont [2/4] (short) %v3254_v61, 128 }
 0x172   : > { %v686_v47 = vadd.f32 %v685_v45, %v4226_v0  ;;  %v959_v48 = vadd.f32 %v958_v46, %v4250_v22  ;;  %v687_v49 = vpop.f32.mrb[15].mxu0  ;;  %v960_v50 = vpop.f32.mrb[15].mxu1 }
 0x173   : > { %v3256_v51 = vpack.i.bf16 %v684_v21, %v682_v41  ;;  %v2821_v52 = vpack.c.bf16 %v957_v44, %v955_v42  ;;  %v688_v53 = vadd.f32 %v687_v49, %v4226_v0  ;;  %v961_v54 = vadd.f32 %v960_v50, %v4250_v22  ;;  %v4298_v4 = vpop.permute.xlu0 %1037  ;;  %v4300_v56 = vpop.permute.xlu1 %1042 }
 0x175   : > { %1378 = vst [vmem:[%s4259_s27 + $0x30] sm:$0xff] %v2821_v52  ;;  %v3258_v63 = vpack.i.bf16 %v688_v53, %v686_v47  ;;  %v2822_v55 = vpack.c.bf16 %v961_v54, %v959_v48  ;;  %3257 = vxpose.xlu1.b32.cont [3/4] (short) %v3256_v51, 128 }
 0x177   : > { %1379 = vst [vmem:[%s4259_s27 + $0x38] sm:$0xff] %v2822_v55  ;;  %v691_v57 = vpop.f32.mrb[16].mxu0  ;;  %v964_v59 = vpop.f32.mrb[16].mxu1 }
 0x178   : > { %v4304_v12 = vadd.f32 %v691_v57, %v4228_v1  ;;  %v965_v13 = vadd.f32 %v964_v59, %v4252_v8  ;;  %v693_v0 = vpop.f32.mrb[17].mxu0  ;;  %v966_v9 = vpop.f32.mrb[17].mxu1 }
 0x179   : > { %v4308_v22 = vadd.f32 %v693_v0, %v4228_v1  ;;  %v967_v19 = vadd.f32 %v966_v9, %v4252_v8  ;;  %v695_v14 = vpop.f32.mrb[18].mxu0  ;;  %v968_v23 = vpop.f32.mrb[18].mxu1  ;;  %3259 = vxpose.xlu1.b32.end [4/4] (short) %v3258_v63, 128 }
 0x17a   : > { %v4312_v15 = vadd.f32 %v695_v14, %v4230_v2  ;;  %v969_v25 = vadd.f32 %v968_v23, %v4254_v18  ;;  %v697_v60 = vpop.f32.mrb[19].mxu0  ;;  %v970_v17 = vpop.f32.mrb[19].mxu1 }
 0x17b   : > { %v3340_v24 = vpack.i.bf16 %v4308_v22, %v4304_v12  ;;  %v2823_v26 = vpack.c.bf16 %v967_v19, %v965_v13  ;;  %v4318_v1 = vadd.f32 %v697_v60, %v4230_v2  ;;  %v971_v8 = vadd.f32 %v970_v17, %v4254_v18  ;;  %v4324_v29 = vpop.permute.xlu0 %1047  ;;  %v4326_v30 = vpop.permute.xlu1 %1052 }
 0x17d   : > { %1380 = vst [vmem:[%s4259_s27 + $0x40] sm:$0xff] %v2823_v26  ;;  %v3342_v27 = vpack.i.bf16 %v4318_v1, %v4312_v15  ;;  %v2824_v28 = vpack.c.bf16 %v971_v8, %v969_v25 }
 0x17f   : > { %1381 = vst [vmem:[%s4259_s27 + $0x48] sm:$0xff] %v2824_v28  ;;  %v701_v31 = vpop.f32.mrb[20].mxu0  ;;  %v974_v32 = vpop.f32.mrb[20].mxu1 }
 0x180   : > { %v4330_v33 = vadd.f32 %v701_v31, %v4232_v3  ;;  %v975_v2 = vadd.f32 %v974_v32, %v4262_v39  ;;  %v703_v34 = vpop.f32.mrb[21].mxu0  ;;  %v976_v18 = vpop.f32.mrb[21].mxu1 }
 0x181   : > { %v4334_v61 = vadd.f32 %v703_v34, %v4232_v3  ;;  %v977_v35 = vadd.f32 %v976_v18, %v4262_v39  ;;  %v705_v37 = vpop.f32.mrb[22].mxu0  ;;  %v978_v38 = vpop.f32.mrb[22].mxu1 }
 0x182   : > { %v4338_v41 = vadd.f32 %v705_v37, %v4234_v5  ;;  %v979_v42 = vadd.f32 %v978_v38, %v4264_v40  ;;  %v707_v43 = vpop.f32.mrb[23].mxu0  ;;  %v980_v62 = vpop.f32.mrb[23].mxu1 }
 0x183   : > { %v3344_v21 = vpack.i.bf16 %v4334_v61, %v4330_v33  ;;  %v2825_v44 = vpack.c.bf16 %v977_v35, %v975_v2  ;;  %v4344_v45 = vadd.f32 %v707_v43, %v4234_v5  ;;  %v981_v3 = vadd.f32 %v980_v62, %v4264_v40  ;;  %v4350_v47 = vpop.permute.xlu0 %1057  ;;  %v4352_v48 = vpop.permute.xlu1 %1062 }
 0x185   : > { %1382 = vst [vmem:[%s4259_s27 + $0x50] sm:$0xff] %v2825_v44  ;;  %v3346_v39 = vpack.i.bf16 %v4344_v45, %v4338_v41  ;;  %v2826_v46 = vpack.c.bf16 %v981_v3, %v979_v42 }
 0x187   : > { %1383 = vst [vmem:[%s4259_s27 + $0x58] sm:$0xff] %v2826_v46  ;;  %v711_v49 = vpop.f32.mrb[24].mxu0  ;;  %v984_v50 = vpop.f32.mrb[24].mxu1 }
 0x188   : > { %v4356_v51 = vadd.f32 %v711_v49, %v4236_v6  ;;  %v985_v5 = vadd.f32 %v984_v50, %v4270_v58  ;;  %v713_v52 = vpop.f32.mrb[25].mxu0  ;;  %v986_v40 = vpop.f32.mrb[25].mxu1 }
 0x189   : > { %v4360_v53 = vadd.f32 %v713_v52, %v4236_v6  ;;  %v987_v54 = vadd.f32 %v986_v40, %v4270_v58  ;;  %v715_v63 = vpop.f32.mrb[26].mxu0  ;;  %v988_v55 = vpop.f32.mrb[26].mxu1 }
 0x18a   : > { %v4364_v57 = vadd.f32 %v715_v63, %v4238_v7  ;;  %v989_v59 = vadd.f32 %v988_v55, %v4272_v16  ;;  %v717_v13 = vpop.f32.mrb[27].mxu0  ;;  %v990_v0 = vpop.f32.mrb[27].mxu1 }
 0x18b   : > { %v3428_v9 = vpack.i.bf16 %v4360_v53, %v4356_v51  ;;  %v2827_v19 = vpack.c.bf16 %v987_v54, %v985_v5  ;;  %v4370_v14 = vadd.f32 %v717_v13, %v4238_v7  ;;  %v991_v6 = vadd.f32 %v990_v0, %v4272_v16  ;;  %v4376_v25 = vpop.permute.xlu0 %1067  ;;  %v4378_v60 = vpop.permute.xlu1 %1072 }
 0x18d   : > { %1384 = vst [vmem:[%s4259_s27 + $0x60] sm:$0xff] %v2827_v19  ;;  %v3430_v58 = vpack.i.bf16 %v4370_v14, %v4364_v57  ;;  %v2828_v23 = vpack.c.bf16 %v991_v6, %v989_v59 }
 0x18f   : > { %1385 = vst [vmem:[%s4259_s27 + $0x68] sm:$0xff] %v2828_v23  ;;  %v721_v17 = vpop.f32.mrb[28].mxu0  ;;  %v994_v26 = vpop.f32.mrb[28].mxu1 }
 0x190   : > { %v4382_v8 = vadd.f32 %v721_v17, %v4240_v10  ;;  %v995_v7 = vadd.f32 %v994_v26, %v4284_v20  ;;  %v723_v28 = vpop.f32.mrb[29].mxu0  ;;  %v996_v16 = vpop.f32.mrb[29].mxu1 }
 0x191   : > { %v4386_v31 = vadd.f32 %v723_v28, %v4240_v10  ;;  %v997_v32 = vadd.f32 %v996_v16, %v4284_v20  ;;  %v725_v2 = vpop.f32.mrb[30].mxu0  ;;  %v998_v34 = vpop.f32.mrb[30].mxu1 }
 0x192   : > { %v4390_v18 = vadd.f32 %v725_v2, %v4242_v11  ;;  %v999_v35 = vadd.f32 %v998_v34, %v4286_v36  ;;  %v727_v37 = vpop.f32.mrb[31].mxu0  ;;  %v1000_v38 = vpop.f32.mrb[31].mxu1 }
 0x193   : > { %v3432_v42 = vpack.i.bf16 %v4386_v31, %v4382_v8  ;;  %v2829_v43 = vpack.c.bf16 %v997_v32, %v995_v7  ;;  %v4396_v62 = vadd.f32 %v727_v37, %v4242_v11  ;;  %v1001_v10 = vadd.f32 %v1000_v38, %v4286_v36  ;;  %v1078_v3 = vpop.permute.xlu0 %1077  ;;  %v1083_v46 = vpop.permute.xlu1 %1082 }
 0x195   : > { %1386 = vst [vmem:[%s4259_s27 + $0x70] sm:$0xff] %v2829_v43  ;;  %v3434_v20 = vpack.i.bf16 %v4396_v62, %v4390_v18  ;;  %v2830_v44 = vpack.c.bf16 %v1001_v10, %v999_v35 }
 0x197   : > { %1387 = vst [vmem:[%s4259_s27 + $0x78] sm:$0xff] %v2830_v44  ;;  %v1197_v49 = vpop.f32.mrb[32].mxu0  ;;  %v1237_v50 = vpop.f32.mrb[32].mxu1 }
 0x198   : > { %v1198_v5 = vadd.f32 %v1197_v49, %v4298_v4  ;;  %v1238_v52 = vadd.f32 %v1237_v50, %v1078_v3  ;;  %v1199_v40 = vpop.f32.mrb[33].mxu0  ;;  %v1239_v54 = vpop.f32.mrb[33].mxu1 }
 0x199   : > { %v1200_v11 = vadd.f32 %v1199_v40, %v4298_v4  ;;  %v1240_v63 = vadd.f32 %v1239_v54, %v1078_v3  ;;  %v1201_v36 = vpop.f32.mrb[34].mxu0  ;;  %v1241_v55 = vpop.f32.mrb[34].mxu1 }
 0x19a   : > { %v1202_v59 = vadd.f32 %v1201_v36, %v4300_v56  ;;  %v1242_v13 = vadd.f32 %v1241_v55, %v1083_v46  ;;  %v1203_v0 = vpop.f32.mrb[35].mxu0  ;;  %v1243_v19 = vpop.f32.mrb[35].mxu1  ;;  %3341 = vxpose.xlu0.b32.start [1/4] (short) %v3340_v24, 128 }
 0x19b   : > { %v2831_v6 = vpack.c.bf16 %v1200_v11, %v1198_v5  ;;  %v2839_v23 = vpack.c.bf16 %v1240_v63, %v1238_v52  ;;  %v1204_v17 = vadd.f32 %v1203_v0, %v4300_v56  ;;  %v1244_v26 = vadd.f32 %v1243_v19, %v1083_v46  ;;  %v1088_v28 = vpop.permute.xlu0 %1087  ;;  %v1093_v16 = vpop.permute.xlu1 %1092 }
 0x19d   : > { %1484 = vst [vmem:[%s4412_s19] sm:$0xff] %v2831_v6  ;;  %1492 = vst [vmem:[%s4412_s19 + $0x40] sm:$0xff] %v2839_v23  ;;  %v2832_v4 = vpack.c.bf16 %v1204_v17, %v1202_v59  ;;  %v2840_v7 = vpack.c.bf16 %v1244_v26, %v1242_v13 }
 0x19e   : > { %3343 = vxpose.xlu0.b32.cont [2/4] (short) %v3342_v27, 128 }
 0x19f   : > { %1485 = vst [vmem:[%s4412_s19 + $0x8] sm:$0xff] %v2832_v4  ;;  %1493 = vst [vmem:[%s4412_s19 + $0x48] sm:$0xff] %v2840_v7  ;;  %v1207_v56 = vpop.f32.mrb[36].mxu0  ;;  %v1247_v12 = vpop.f32.mrb[36].mxu1 }
 0x1a0   : > { %v1208_v22 = vadd.f32 %v1207_v56, %v4324_v29  ;;  %v1248_v24 = vadd.f32 %v1247_v12, %v1088_v28  ;;  %v1209_v32 = vpop.f32.mrb[37].mxu0  ;;  %v1249_v2 = vpop.f32.mrb[37].mxu1 }
 0x1a1   : > { %v1210_v34 = vadd.f32 %v1209_v32, %v4324_v29  ;;  %v1250_v35 = vadd.f32 %v1249_v2, %v1088_v28  ;;  %v1211_v37 = vpop.f32.mrb[38].mxu0  ;;  %v1251_v38 = vpop.f32.mrb[38].mxu1 }
 0x1a2   : > { %v1212_v43 = vadd.f32 %v1211_v37, %v4326_v30  ;;  %v1252_v15 = vadd.f32 %v1251_v38, %v1093_v16  ;;  %v1213_v1 = vpop.f32.mrb[39].mxu0  ;;  %v1253_v27 = vpop.f32.mrb[39].mxu1  ;;  %3345 = vxpose.xlu0.b32.cont [3/4] (short) %v3344_v21, 128 }
 0x1a3   : > { %v2833_v10 = vpack.c.bf16 %v1210_v34, %v1208_v22  ;;  %v2841_v44 = vpack.c.bf16 %v1250_v35, %v1248_v24  ;;  %v1214_v3 = vadd.f32 %v1213_v1, %v4326_v30  ;;  %v1254_v46 = vadd.f32 %v1253_v27, %v1093_v16  ;;  %v1098_v50 = vpop.permute.xlu0 %1097  ;;  %v1103_v5 = vpop.permute.xlu1 %1102 }
 0x1a5   : > { %1486 = vst [vmem:[%s4412_s19 + $0x10] sm:$0xff] %v2833_v10  ;;  %1494 = vst [vmem:[%s4412_s19 + $0x50] sm:$0xff] %v2841_v44  ;;  %v2834_v29 = vpack.c.bf16 %v1214_v3, %v1212_v43  ;;  %v2842_v49 = vpack.c.bf16 %v1254_v46, %v1252_v15 }
 0x1a6   : > { %3347 = vxpose.xlu0.b32.end [4/4] (short) %v3346_v39, 128 }
 0x1a7   : > { %1487 = vst [vmem:[%s4412_s19 + $0x18] sm:$0xff] %v2834_v29  ;;  %1495 = vst [vmem:[%s4412_s19 + $0x58] sm:$0xff] %v2842_v49  ;;  %v1217_v52 = vpop.f32.mrb[40].mxu0  ;;  %v1257_v33 = vpop.f32.mrb[40].mxu1 }
 0x1a8   : > { %v1218_v61 = vadd.f32 %v1217_v52, %v4350_v47  ;;  %v1258_v21 = vadd.f32 %v1257_v33, %v1098_v50  ;;  %v1219_v30 = vpop.f32.mrb[41].mxu0  ;;  %v1259_v40 = vpop.f32.mrb[41].mxu1 }
 0x1a9   : > { %v1220_v54 = vadd.f32 %v1219_v30, %v4350_v47  ;;  %v1260_v11 = vadd.f32 %v1259_v40, %v1098_v50  ;;  %v1221_v63 = vpop.f32.mrb[42].mxu0  ;;  %v1261_v36 = vpop.f32.mrb[42].mxu1 }
 0x1aa   : > { %v1222_v55 = vadd.f32 %v1221_v63, %v4352_v48  ;;  %v1262_v41 = vadd.f32 %v1261_v36, %v1103_v5  ;;  %v1223_v45 = vpop.f32.mrb[43].mxu0  ;;  %v1263_v39 = vpop.f32.mrb[43].mxu1  ;;  %3429 = vxpose.xlu1.b32.start [1/4] (short) %v3428_v9, 128 }
 0x1ab   : > { %v2835_v59 = vpack.c.bf16 %v1220_v54, %v1218_v61  ;;  %v2843_v13 = vpack.c.bf16 %v1260_v11, %v1258_v21  ;;  %v1224_v0 = vadd.f32 %v1223_v45, %v4352_v48  ;;  %v1264_v19 = vadd.f32 %v1263_v39, %v1103_v5  ;;  %v1108_v23 = vpop.permute.xlu0 %1107  ;;  %v1113_v17 = vpop.permute.xlu1 %1112 }
 0x1ad   : > { %1488 = vst [vmem:[%s4412_s19 + $0x20] sm:$0xff] %v2835_v59  ;;  %1496 = vst [vmem:[%s4412_s19 + $0x60] sm:$0xff] %v2843_v13  ;;  %v2836_v47 = vpack.c.bf16 %v1224_v0, %v1222_v55  ;;  %v2844_v6 = vpack.c.bf16 %v1264_v19, %v1262_v41 }
 0x1ae   : > { %3431 = vxpose.xlu1.b32.cont [2/4] (short) %v3430_v58, 128 }
 0x1af   : > { %1489 = vst [vmem:[%s4412_s19 + $0x28] sm:$0xff] %v2836_v47  ;;  %1497 = vst [vmem:[%s4412_s19 + $0x68] sm:$0xff] %v2844_v6  ;;  %v1227_v26 = vpop.f32.mrb[44].mxu0  ;;  %v1267_v51 = vpop.f32.mrb[44].mxu1 }
 0x1b0   : > { %v1228_v53 = vadd.f32 %v1227_v26, %v4376_v25  ;;  %v1268_v9 = vadd.f32 %v1267_v51, %v1108_v23  ;;  %v1229_v48 = vpop.f32.mrb[45].mxu0  ;;  %v1269_v4 = vpop.f32.mrb[45].mxu1 }
 0x1b1   : > { %v1230_v7 = vadd.f32 %v1229_v48, %v4376_v25  ;;  %v1270_v28 = vadd.f32 %v1269_v4, %v1108_v23  ;;  %v1231_v16 = vpop.f32.mrb[46].mxu0  ;;  %v1271_v56 = vpop.f32.mrb[46].mxu1 }
 0x1b2   : > { %v1232_v57 = vadd.f32 %v1231_v16, %v4378_v60  ;;  %v1272_v14 = vadd.f32 %v1271_v56, %v1113_v17  ;;  %v1233_v58 = vpop.f32.mrb[47].mxu0  ;;  %v1273_v12 = vpop.f32.mrb[47].mxu1  ;;  %3433 = vxpose.xlu1.b32.cont [3/4] (short) %v3432_v42, 128 }
 0x1b3   : > { %v2837_v22 = vpack.c.bf16 %v1230_v7, %v1228_v53  ;;  %v2845_v24 = vpack.c.bf16 %v1270_v28, %v1268_v9  ;;  %v1234_v25 = vadd.f32 %v1233_v58, %v4378_v60  ;;  %v1274_v32 = vadd.f32 %v1273_v12, %v1113_v17 }
 0x1b5   : > { %1490 = vst [vmem:[%s4412_s19 + $0x30] sm:$0xff] %v2837_v22  ;;  %1498 = vst [vmem:[%s4412_s19 + $0x70] sm:$0xff] %v2845_v24  ;;  %v2838_v2 = vpack.c.bf16 %v1234_v25, %v1232_v57  ;;  %v2846_v34 = vpack.c.bf16 %v1274_v32, %v1272_v14 }
 0x1b6   : > { %3435 = vxpose.xlu1.b32.end [4/4] (short) %v3434_v20, 128 }
 0x1b7   : > { %1491 = vst [vmem:[%s4412_s19 + $0x38] sm:$0xff] %v2838_v2  ;;  %1499 = vst [vmem:[%s4412_s19 + $0x78] sm:$0xff] %v2846_v34 }
 0x1dd   : > { %v3172_v8 = vpop.trf.xlu0 }
 0x1de   : > { %v3176_v31 = vunpack.i.h.bf16 %v3172_v8  ;;  %v3173_v42 = vunpack.i.l.bf16 %v3172_v8 }
 0x1e0   : > { %v2863_v60 = vpack.c.bf16 %v3176_v31, %v3176_v31  ;;  %v2847_v18 = vpack.c.bf16 %v3173_v42, %v3173_v42 }
 0x1e1   : > { %v3177_v62 = vpop.trf.xlu0 }
 0x1e2   : > { %2285 = vst.msk [vmem:[%s4468_s15 + $0x40] sm:$0xf] %vm2268_vm0, %v2863_v60  ;;  %2269 = vst.msk [vmem:[%s4468_s15] sm:$0xf] %vm2268_vm0, %v2847_v18  ;;  %v3181_v20 = vunpack.i.h.bf16 %v3177_v62  ;;  %v3178_v35 = vunpack.i.l.bf16 %v3177_v62 }
 0x1e4   : > { %v2864_v37 = vpack.c.bf16 %v3181_v20, %v3181_v20  ;;  %v2848_v38 = vpack.c.bf16 %v3178_v35, %v3178_v35 }
 0x1e5   : > { %v3182_v43 = vpop.trf.xlu0 }
 0x1e6   : > { %2286 = vst.msk [vmem:[%s4468_s15 + $0x44] sm:$0xf] %vm2268_vm0, %v2864_v37  ;;  %2270 = vst.msk [vmem:[%s4468_s15 + $0x4] sm:$0xf] %vm2268_vm0, %v2848_v38  ;;  %v3186_v15 = vunpack.i.h.bf16 %v3182_v43  ;;  %v3183_v1 = vunpack.i.l.bf16 %v3182_v43 }
 0x1e8   : > { %v2865_v27 = vpack.c.bf16 %v3186_v15, %v3186_v15  ;;  %v2849_v10 = vpack.c.bf16 %v3183_v1, %v3183_v1 }
 0x1e9   : > { %v3187_v44 = vpop.trf.xlu0 }
 0x1ea   : > { %2287 = vst.msk [vmem:[%s4468_s15 + $0x48] sm:$0xf] %vm2268_vm0, %v2865_v27  ;;  %2271 = vst.msk [vmem:[%s4468_s15 + $0x8] sm:$0xf] %vm2268_vm0, %v2849_v10  ;;  %v3191_v3 = vunpack.i.h.bf16 %v3187_v44  ;;  %v3188_v46 = vunpack.i.l.bf16 %v3187_v44 }
 0x1ec   : > { %v2866_v29 = vpack.c.bf16 %v3191_v3, %v3191_v3  ;;  %v2850_v49 = vpack.c.bf16 %v3188_v46, %v3188_v46 }
 0x1ed   : > { %v3260_v50 = vpop.trf.xlu1  ;;  %v3192_v5 = vpop.trf.xlu0 }
 0x1ee   : > { %v3264_v52 = vunpack.i.h.bf16 %v3260_v50  ;;  %v3261_v33 = vunpack.i.l.bf16 %v3260_v50  ;;  %2288 = vst.msk [vmem:[%s4468_s15 + $0x4c] sm:$0xf] %vm2268_vm0, %v2866_v29  ;;  %2272 = vst.msk [vmem:[%s4468_s15 + $0xc] sm:$0xf] %vm2268_vm0, %v2850_v49  ;;  %v3196_v61 = vunpack.i.h.bf16 %v3192_v5  ;;  %v3193_v21 = vunpack.i.l.bf16 %v3192_v5 }
 0x1f0   : > { %v2895_v30 = vpack.c.bf16 %v3264_v52, %v3264_v52  ;;  %v2879_v40 = vpack.c.bf16 %v3261_v33, %v3261_v33 }
 0x1f1   : > { %3583 = shalt.err (!%p3580_p4)
}
 0x1f2   : > { %s3584_s29 = scalar_lea.hbm %s4489_s25, 2048  ;;  %s3588_s17 = scalar_lea.hbm %s4832_s8, 4096 }
 0x1f3   : > { %p3585_p7 = scmp.ne.s32.totalorder %s4489_s25, %s3584_s29  ;;  %p3589_p1 = scmp.lt.u32.totalorder %s4489_s25, %s4832_s8 }
 0x1f4   : > { %p3590_p3 = scmp.lt.u32.totalorder %s3588_s17, %s3584_s29  ;;  %p3592_p9 = scmp.lt.u32.totalorder %s3584_s29, %s4489_s25 }
 0x1f5   : > { %p3586_p10 = pnand %p3585_p7, %p4846_p11 }
 0x1f6   : > { %p3591_p8 = por %p3590_p3, %p3589_p1 }
 0x1f7   : > { %p3587_p12 = pneg %p3586_p10 }
 0x1f8   : > { %p3593_p0 = por %p3592_p9, %p3591_p8 }
 0x1fa   : > { %p3594_p6 = pnand %p3593_p0, %p3587_p12 }
 0x1fc   : > { %3597 = shalt.err (!%p3594_p6)
}
 0x1fd   : > { %s3691_s26 = smov 128   ;;  %s3692_s28 = smov 8   ;;  %v3265_v54 = vpop.trf.xlu1  ;;  %v2867_v11 = vpack.c.bf16 %v3196_v61, %v3196_v61  ;;  %v2851_v63 = vpack.c.bf16 %v3193_v21, %v3193_v21  ;;  %v3197_v36 = vpop.trf.xlu0  ;;  %2317 = vst.msk [vmem:[%s4468_s15 + $0xc0] sm:$0xf] %vm2268_vm0, %v2895_v30  ;;  %2301 = vst.msk [vmem:[%s4468_s15 + $0x80] sm:$0xf] %vm2268_vm0, %v2879_v40 }
 0x1fe   : > { %s4847_s0 = scalar_lea.sflag [#allocation4], %s3856_s16  ;;  %s4848_s27 = sshll.u32 %s3676_s12, 11  ;;  %v3269_v55 = vunpack.i.h.bf16 %v3265_v54  ;;  %v3266_v41 = vunpack.i.l.bf16 %v3265_v54  ;;  %v3201_v45 = vunpack.i.h.bf16 %v3197_v36  ;;  %v3198_v39 = vunpack.i.l.bf16 %v3197_v36 }
 0x1ff   : > { %3091 = dma.vmem_to_hbm [thread:$0]  (%p4846_p11), %s4495_s18, 2048, %s4489_s25, %s4847_s0, %s3691_s26, %s3691_s26, %s3692_s28  }
 0x200   : > { %s4529_s17 = scalar_lea.hbm %s4833_s9, %s4848_s27  ;;  %s2449_s21 = sshll.u32 %s4412_s19, 4  ;;  %2289 = vst.msk [vmem:[%s4468_s15 + $0x50] sm:$0xf] %vm2268_vm0, %v2867_v11  ;;  %2273 = vst.msk [vmem:[%s4468_s15 + $0x10] sm:$0xf] %vm2268_vm0, %v2851_v63  ;;  %s4536_s21 = int_to_ptr.vmem [resolvable:$true] %s2449_s21 }
 0x201   : > { %s3598_s18 = scalar_lea.vmem %s4536_s21, 2048  ;;  %s3693_s19 = smov [#allocation6]  }
 0x202   : > { %p3599_p13 = scmp.ne.s32.totalorder %s4536_s21, %s3598_s18  ;;  %s3602_s25 = sshll.u32 %s3693_s19, 4  ;;  %s3603_s25 = int_to_ptr.vmem [resolvable:$false] %s3602_s25 }
 0x203   : > { %s3604_s0 = scalar_lea.vmem %s3603_s25, 4096  ;;  %p3605_p4 = scmp.lt.s32.totalorder %s4536_s21, %s3603_s25 }
 0x204   : > { %p3600_p2 = pnand %p3599_p13, %p4846_p11  ;;  %p3606_p7 = scmp.lt.s32.totalorder %s3604_s0, %s3598_s18 }
 0x206   : > { %p3601_p5 = pneg %p3600_p2  ;;  %p3607_p10 = por %p3606_p7, %p3605_p4 }
 0x208   : > { %p3608_p12 = pnand %p3607_p10, %p3601_p5 }
 0x20a   : > { %3611 = shalt.err (!%p3608_p12)
}
 0x20b   : > { %s3612_s27 = scalar_lea.hbm %s4529_s17, 2048  ;;  %s3616_s19 = scalar_lea.hbm %s4833_s9, 4096 }
 0x20c   : > { %p3613_p1 = scmp.ne.s32.totalorder %s4529_s17, %s3612_s27  ;;  %p3617_p9 = scmp.lt.u32.totalorder %s4529_s17, %s4833_s9 }
 0x20d   : > { %p3618_p0 = scmp.lt.u32.totalorder %s3616_s19, %s3612_s27  ;;  %p3620_p13 = scmp.lt.u32.totalorder %s3612_s27, %s4529_s17 }
 0x20e   : > { %p3614_p3 = pnand %p3613_p1, %p4846_p11 }
 0x20f   : > { %p3619_p6 = por %p3618_p0, %p3617_p9 }
 0x210   : > { %p3615_p8 = pneg %p3614_p3 }
 0x211   : > { %p3621_p2 = por %p3620_p13, %p3619_p6 }
 0x213   : > { %p3622_p5 = pnand %p3621_p2, %p3615_p8 }
 0x215   : > { %3625 = shalt.err (!%p3622_p5)
}
 0x216   : > { %s4849_s18 = scalar_lea.sflag [#allocation7], %s3856_s16  ;;  %v2896_v59 = vpack.c.bf16 %v3269_v55, %v3269_v55  ;;  %v2880_v13 = vpack.c.bf16 %v3266_v41, %v3266_v41  ;;  %v3270_v0 = vpop.trf.xlu1  ;;  %v2868_v19 = vpack.c.bf16 %v3201_v45, %v3201_v45  ;;  %v2852_v47 = vpack.c.bf16 %v3198_v39, %v3198_v39  ;;  %v3202_v6 = vpop.trf.xlu0 }
 0x217   : > { %3092 = dma.vmem_to_hbm [thread:$0]  (%p4846_p11), %s4536_s21, 2048, %s4529_s17, %s4849_s18, %s3691_s26, %s3691_s26, %s3692_s28   ;;  %v3274_v23 = vunpack.i.h.bf16 %v3270_v0  ;;  %v3271_v17 = vunpack.i.l.bf16 %v3270_v0  ;;  %v3206_v26 = vunpack.i.h.bf16 %v3202_v6  ;;  %v3203_v51 = vunpack.i.l.bf16 %v3202_v6 }
 0x218   : > { %2318 = vst.msk [vmem:[%s4468_s15 + $0xc4] sm:$0xf] %vm2268_vm0, %v2896_v59  ;;  %2302 = vst.msk [vmem:[%s4468_s15 + $0x84] sm:$0xf] %vm2268_vm0, %v2880_v13 }
 0x219   : > { %2290 = vst.msk [vmem:[%s4468_s15 + $0x54] sm:$0xf] %vm2268_vm0, %v2868_v19  ;;  %2274 = vst.msk [vmem:[%s4468_s15 + $0x14] sm:$0xf] %vm2268_vm0, %v2852_v47  ;;  %v2897_v53 = vpack.c.bf16 %v3274_v23, %v3274_v23  ;;  %v2881_v9 = vpack.c.bf16 %v3271_v17, %v3271_v17  ;;  %v2869_v4 = vpack.c.bf16 %v3206_v26, %v3206_v26 }
 0x21a   : > { %v3275_v48 = vpop.trf.xlu1  ;;  %v2853_v7 = vpack.c.bf16 %v3203_v51, %v3203_v51  ;;  %v3207_v28 = vpop.trf.xlu0 }
 0x21b   : > { %2319 = vst.msk [vmem:[%s4468_s15 + $0xc8] sm:$0xf] %vm2268_vm0, %v2897_v53  ;;  %2303 = vst.msk [vmem:[%s4468_s15 + $0x88] sm:$0xf] %vm2268_vm0, %v2881_v9  ;;  %v3279_v16 = vunpack.i.h.bf16 %v3275_v48  ;;  %v3276_v56 = vunpack.i.l.bf16 %v3275_v48  ;;  %v3211_v57 = vunpack.i.h.bf16 %v3207_v28  ;;  %v3208_v14 = vunpack.i.l.bf16 %v3207_v28 }
 0x21c   : > { %2291 = vst.msk [vmem:[%s4468_s15 + $0x58] sm:$0xf] %vm2268_vm0, %v2869_v4  ;;  %2275 = vst.msk [vmem:[%s4468_s15 + $0x18] sm:$0xf] %vm2268_vm0, %v2853_v7 }
 0x21d   : > { %v2898_v58 = vpack.c.bf16 %v3279_v16, %v3279_v16  ;;  %v2882_v12 = vpack.c.bf16 %v3276_v56, %v3276_v56  ;;  %v2870_v24 = vpack.c.bf16 %v3211_v57, %v3211_v57  ;;  %v2854_v25 = vpack.c.bf16 %v3208_v14, %v3208_v14 }
 0x21e   : > { %v3280_v22 = vpop.trf.xlu1  ;;  %v3212_v32 = vpop.trf.xlu0 }
 0x21f   : > { %2320 = vst.msk [vmem:[%s4468_s15 + $0xcc] sm:$0xf] %vm2268_vm0, %v2898_v58  ;;  %2304 = vst.msk [vmem:[%s4468_s15 + $0x8c] sm:$0xf] %vm2268_vm0, %v2882_v12  ;;  %v3284_v2 = vunpack.i.h.bf16 %v3280_v22  ;;  %v3281_v34 = vunpack.i.l.bf16 %v3280_v22  ;;  %v3216_v8 = vunpack.i.h.bf16 %v3212_v32  ;;  %v3213_v31 = vunpack.i.l.bf16 %v3212_v32 }
 0x220   : > { %2292 = vst.msk [vmem:[%s4468_s15 + $0x5c] sm:$0xf] %vm2268_vm0, %v2870_v24  ;;  %2276 = vst.msk [vmem:[%s4468_s15 + $0x1c] sm:$0xf] %vm2268_vm0, %v2854_v25 }
 0x221   : > { %v2899_v42 = vpack.c.bf16 %v3284_v2, %v3284_v2  ;;  %v2883_v60 = vpack.c.bf16 %v3281_v34, %v3281_v34  ;;  %v2871_v62 = vpack.c.bf16 %v3216_v8, %v3216_v8  ;;  %v2855_v20 = vpack.c.bf16 %v3213_v31, %v3213_v31 }
 0x222   : > { %v3285_v18 = vpop.trf.xlu1  ;;  %v3217_v35 = vpop.trf.xlu0 }
 0x223   : > { %2321 = vst.msk [vmem:[%s4468_s15 + $0xd0] sm:$0xf] %vm2268_vm0, %v2899_v42  ;;  %2305 = vst.msk [vmem:[%s4468_s15 + $0x90] sm:$0xf] %vm2268_vm0, %v2883_v60  ;;  %v3289_v37 = vunpack.i.h.bf16 %v3285_v18  ;;  %v3286_v38 = vunpack.i.l.bf16 %v3285_v18  ;;  %v3221_v43 = vunpack.i.h.bf16 %v3217_v35  ;;  %v3218_v15 = vunpack.i.l.bf16 %v3217_v35 }
 0x224   : > { %2293 = vst.msk [vmem:[%s4468_s15 + $0x60] sm:$0xf] %vm2268_vm0, %v2871_v62  ;;  %2277 = vst.msk [vmem:[%s4468_s15 + $0x20] sm:$0xf] %vm2268_vm0, %v2855_v20 }
 0x225   : > { %v2900_v1 = vpack.c.bf16 %v3289_v37, %v3289_v37  ;;  %v2884_v27 = vpack.c.bf16 %v3286_v38, %v3286_v38  ;;  %v2872_v44 = vpack.c.bf16 %v3221_v43, %v3221_v43  ;;  %v2856_v3 = vpack.c.bf16 %v3218_v15, %v3218_v15 }
 0x226   : > { %v3290_v10 = vpop.trf.xlu1  ;;  %v3222_v46 = vpop.trf.xlu0 }
 0x227   : > { %2322 = vst.msk [vmem:[%s4468_s15 + $0xd4] sm:$0xf] %vm2268_vm0, %v2900_v1  ;;  %2306 = vst.msk [vmem:[%s4468_s15 + $0x94] sm:$0xf] %vm2268_vm0, %v2884_v27  ;;  %v3294_v29 = vunpack.i.h.bf16 %v3290_v10  ;;  %v3291_v49 = vunpack.i.l.bf16 %v3290_v10  ;;  %v3226_v50 = vunpack.i.h.bf16 %v3222_v46  ;;  %v3223_v5 = vunpack.i.l.bf16 %v3222_v46 }
 0x228   : > { %2294 = vst.msk [vmem:[%s4468_s15 + $0x64] sm:$0xf] %vm2268_vm0, %v2872_v44  ;;  %2278 = vst.msk [vmem:[%s4468_s15 + $0x24] sm:$0xf] %vm2268_vm0, %v2856_v3 }
 0x229   : > { %v2901_v52 = vpack.c.bf16 %v3294_v29, %v3294_v29  ;;  %v2885_v33 = vpack.c.bf16 %v3291_v49, %v3291_v49  ;;  %v2873_v21 = vpack.c.bf16 %v3226_v50, %v3226_v50  ;;  %v2857_v30 = vpack.c.bf16 %v3223_v5, %v3223_v5 }
 0x22a   : > { %v3295_v61 = vpop.trf.xlu1  ;;  %v3227_v40 = vpop.trf.xlu0 }
 0x22b   : > { %2323 = vst.msk [vmem:[%s4468_s15 + $0xd8] sm:$0xf] %vm2268_vm0, %v2901_v52  ;;  %2307 = vst.msk [vmem:[%s4468_s15 + $0x98] sm:$0xf] %vm2268_vm0, %v2885_v33  ;;  %v3299_v54 = vunpack.i.h.bf16 %v3295_v61  ;;  %v3296_v11 = vunpack.i.l.bf16 %v3295_v61  ;;  %v3231_v63 = vunpack.i.h.bf16 %v3227_v40  ;;  %v3228_v36 = vunpack.i.l.bf16 %v3227_v40 }
 0x22c   : > { %2295 = vst.msk [vmem:[%s4468_s15 + $0x68] sm:$0xf] %vm2268_vm0, %v2873_v21  ;;  %2279 = vst.msk [vmem:[%s4468_s15 + $0x28] sm:$0xf] %vm2268_vm0, %v2857_v30 }
 0x22d   : > { %v2902_v55 = vpack.c.bf16 %v3299_v54, %v3299_v54  ;;  %v2886_v41 = vpack.c.bf16 %v3296_v11, %v3296_v11  ;;  %v2874_v39 = vpack.c.bf16 %v3231_v63, %v3231_v63  ;;  %v2858_v59 = vpack.c.bf16 %v3228_v36, %v3228_v36 }
 0x22e   : > { %v3300_v45 = vpop.trf.xlu1  ;;  %v3232_v13 = vpop.trf.xlu0 }
 0x22f   : > { %2324 = vst.msk [vmem:[%s4468_s15 + $0xdc] sm:$0xf] %vm2268_vm0, %v2902_v55  ;;  %2308 = vst.msk [vmem:[%s4468_s15 + $0x9c] sm:$0xf] %vm2268_vm0, %v2886_v41  ;;  %v3304_v0 = vunpack.i.h.bf16 %v3300_v45  ;;  %v3301_v19 = vunpack.i.l.bf16 %v3300_v45  ;;  %v3236_v47 = vunpack.i.h.bf16 %v3232_v13  ;;  %v3233_v6 = vunpack.i.l.bf16 %v3232_v13 }
 0x230   : > { %2296 = vst.msk [vmem:[%s4468_s15 + $0x6c] sm:$0xf] %vm2268_vm0, %v2874_v39  ;;  %2280 = vst.msk [vmem:[%s4468_s15 + $0x2c] sm:$0xf] %vm2268_vm0, %v2858_v59 }
 0x231   : > { %v2903_v23 = vpack.c.bf16 %v3304_v0, %v3304_v0  ;;  %v2887_v17 = vpack.c.bf16 %v3301_v19, %v3301_v19  ;;  %v2875_v51 = vpack.c.bf16 %v3236_v47, %v3236_v47  ;;  %v2859_v53 = vpack.c.bf16 %v3233_v6, %v3233_v6 }
 0x232   : > { %v3305_v26 = vpop.trf.xlu1  ;;  %v3237_v9 = vpop.trf.xlu0 }
 0x233   : > { %2325 = vst.msk [vmem:[%s4468_s15 + $0xe0] sm:$0xf] %vm2268_vm0, %v2903_v23  ;;  %2309 = vst.msk [vmem:[%s4468_s15 + $0xa0] sm:$0xf] %vm2268_vm0, %v2887_v17  ;;  %v3309_v48 = vunpack.i.h.bf16 %v3305_v26  ;;  %v3306_v4 = vunpack.i.l.bf16 %v3305_v26  ;;  %v3241_v7 = vunpack.i.h.bf16 %v3237_v9  ;;  %v3238_v28 = vunpack.i.l.bf16 %v3237_v9 }
 0x234   : > { %2297 = vst.msk [vmem:[%s4468_s15 + $0x70] sm:$0xf] %vm2268_vm0, %v2875_v51  ;;  %2281 = vst.msk [vmem:[%s4468_s15 + $0x30] sm:$0xf] %vm2268_vm0, %v2859_v53 }
 0x235   : > { %v2904_v16 = vpack.c.bf16 %v3309_v48, %v3309_v48  ;;  %v2888_v56 = vpack.c.bf16 %v3306_v4, %v3306_v4  ;;  %v2876_v14 = vpack.c.bf16 %v3241_v7, %v3241_v7  ;;  %v2860_v58 = vpack.c.bf16 %v3238_v28, %v3238_v28 }
 0x236   : > { %v3310_v57 = vpop.trf.xlu1  ;;  %v3242_v12 = vpop.trf.xlu0 }
 0x237   : > { %2326 = vst.msk [vmem:[%s4468_s15 + $0xe4] sm:$0xf] %vm2268_vm0, %v2904_v16  ;;  %2310 = vst.msk [vmem:[%s4468_s15 + $0xa4] sm:$0xf] %vm2268_vm0, %v2888_v56  ;;  %v3314_v22 = vunpack.i.h.bf16 %v3310_v57  ;;  %v3311_v24 = vunpack.i.l.bf16 %v3310_v57  ;;  %v3246_v25 = vunpack.i.h.bf16 %v3242_v12  ;;  %v3243_v32 = vunpack.i.l.bf16 %v3242_v12 }
 0x238   : > { %2298 = vst.msk [vmem:[%s4468_s15 + $0x74] sm:$0xf] %vm2268_vm0, %v2876_v14  ;;  %2282 = vst.msk [vmem:[%s4468_s15 + $0x34] sm:$0xf] %vm2268_vm0, %v2860_v58 }
 0x239   : > { %v2905_v2 = vpack.c.bf16 %v3314_v22, %v3314_v22  ;;  %v2889_v34 = vpack.c.bf16 %v3311_v24, %v3311_v24  ;;  %v2877_v31 = vpack.c.bf16 %v3246_v25, %v3246_v25  ;;  %v2861_v42 = vpack.c.bf16 %v3243_v32, %v3243_v32 }
 0x23a   : > { %v3315_v8 = vpop.trf.xlu1  ;;  %v3247_v60 = vpop.trf.xlu0 }
 0x23b   : > { %2327 = vst.msk [vmem:[%s4468_s15 + $0xe8] sm:$0xf] %vm2268_vm0, %v2905_v2  ;;  %2311 = vst.msk [vmem:[%s4468_s15 + $0xa8] sm:$0xf] %vm2268_vm0, %v2889_v34  ;;  %v3319_v18 = vunpack.i.h.bf16 %v3315_v8  ;;  %v3316_v62 = vunpack.i.l.bf16 %v3315_v8  ;;  %v3251_v20 = vunpack.i.h.bf16 %v3247_v60  ;;  %v3248_v35 = vunpack.i.l.bf16 %v3247_v60 }
 0x23c   : > { %2299 = vst.msk [vmem:[%s4468_s15 + $0x78] sm:$0xf] %vm2268_vm0, %v2877_v31  ;;  %2283 = vst.msk [vmem:[%s4468_s15 + $0x38] sm:$0xf] %vm2268_vm0, %v2861_v42 }
 0x23d   : > { %v2906_v37 = vpack.c.bf16 %v3319_v18, %v3319_v18  ;;  %v2890_v38 = vpack.c.bf16 %v3316_v62, %v3316_v62  ;;  %v2878_v15 = vpack.c.bf16 %v3251_v20, %v3251_v20  ;;  %v2862_v1 = vpack.c.bf16 %v3248_v35, %v3248_v35 }
 0x23e   : > { %v3320_v43 = vpop.trf.xlu1  ;;  %v3348_v27 = vpop.trf.xlu0 }
 0x23f   : > { %2328 = vst.msk [vmem:[%s4468_s15 + $0xec] sm:$0xf] %vm2268_vm0, %v2906_v37  ;;  %2312 = vst.msk [vmem:[%s4468_s15 + $0xac] sm:$0xf] %vm2268_vm0, %v2890_v38  ;;  %v3324_v10 = vunpack.i.h.bf16 %v3320_v43  ;;  %v3321_v44 = vunpack.i.l.bf16 %v3320_v43  ;;  %v3352_v3 = vunpack.i.h.bf16 %v3348_v27  ;;  %v3349_v46 = vunpack.i.l.bf16 %v3348_v27 }
 0x240   : > { %2300 = vst.msk [vmem:[%s4468_s15 + $0x7c] sm:$0xf] %vm2268_vm0, %v2878_v15  ;;  %2284 = vst.msk [vmem:[%s4468_s15 + $0x3c] sm:$0xf] %vm2268_vm0, %v2862_v1 }
 0x241   : > { %v2907_v29 = vpack.c.bf16 %v3324_v10, %v3324_v10  ;;  %v2891_v49 = vpack.c.bf16 %v3321_v44, %v3321_v44  ;;  %v2927_v5 = vpack.c.bf16 %v3352_v3, %v3352_v3  ;;  %v2911_v52 = vpack.c.bf16 %v3349_v46, %v3349_v46 }
 0x242   : > { %v3325_v50 = vpop.trf.xlu1  ;;  %v3353_v33 = vpop.trf.xlu0 }
 0x243   : > { %2329 = vst.msk [vmem:[%s4468_s15 + $0xf0] sm:$0xf] %vm2268_vm0, %v2907_v29  ;;  %2313 = vst.msk [vmem:[%s4468_s15 + $0xb0] sm:$0xf] %vm2268_vm0, %v2891_v49  ;;  %v3329_v61 = vunpack.i.h.bf16 %v3325_v50  ;;  %v3326_v21 = vunpack.i.l.bf16 %v3325_v50  ;;  %v3357_v30 = vunpack.i.h.bf16 %v3353_v33  ;;  %v3354_v40 = vunpack.i.l.bf16 %v3353_v33 }
 0x244   : > { %2349 = vst.msk [vmem:[%s4468_s15 + $0x140] sm:$0xf] %vm2268_vm0, %v2927_v5  ;;  %2333 = vst.msk [vmem:[%s4468_s15 + $0x100] sm:$0xf] %vm2268_vm0, %v2911_v52 }
 0x245   : > { %v2908_v54 = vpack.c.bf16 %v3329_v61, %v3329_v61  ;;  %v2892_v11 = vpack.c.bf16 %v3326_v21, %v3326_v21  ;;  %v2928_v36 = vpack.c.bf16 %v3357_v30, %v3357_v30  ;;  %v2912_v55 = vpack.c.bf16 %v3354_v40, %v3354_v40 }
 0x246   : > { %v3330_v63 = vpop.trf.xlu1  ;;  %v3358_v41 = vpop.trf.xlu0 }
 0x247   : > { %2330 = vst.msk [vmem:[%s4468_s15 + $0xf4] sm:$0xf] %vm2268_vm0, %v2908_v54  ;;  %2314 = vst.msk [vmem:[%s4468_s15 + $0xb4] sm:$0xf] %vm2268_vm0, %v2892_v11  ;;  %v3334_v45 = vunpack.i.h.bf16 %v3330_v63  ;;  %v3331_v39 = vunpack.i.l.bf16 %v3330_v63  ;;  %v3362_v59 = vunpack.i.h.bf16 %v3358_v41  ;;  %v3359_v13 = vunpack.i.l.bf16 %v3358_v41 }
 0x248   : > { %2350 = vst.msk [vmem:[%s4468_s15 + $0x144] sm:$0xf] %vm2268_vm0, %v2928_v36  ;;  %2334 = vst.msk [vmem:[%s4468_s15 + $0x104] sm:$0xf] %vm2268_vm0, %v2912_v55 }
 0x249   : > { %v2909_v0 = vpack.c.bf16 %v3334_v45, %v3334_v45  ;;  %v2893_v19 = vpack.c.bf16 %v3331_v39, %v3331_v39  ;;  %v2929_v6 = vpack.c.bf16 %v3362_v59, %v3362_v59  ;;  %v2913_v23 = vpack.c.bf16 %v3359_v13, %v3359_v13 }
 0x24a   : > { %v3335_v47 = vpop.trf.xlu1  ;;  %v3363_v17 = vpop.trf.xlu0 }
 0x24b   : > { %2331 = vst.msk [vmem:[%s4468_s15 + $0xf8] sm:$0xf] %vm2268_vm0, %v2909_v0  ;;  %2315 = vst.msk [vmem:[%s4468_s15 + $0xb8] sm:$0xf] %vm2268_vm0, %v2893_v19  ;;  %v3339_v26 = vunpack.i.h.bf16 %v3335_v47  ;;  %v3336_v51 = vunpack.i.l.bf16 %v3335_v47  ;;  %v3367_v53 = vunpack.i.h.bf16 %v3363_v17  ;;  %v3364_v9 = vunpack.i.l.bf16 %v3363_v17 }
 0x24c   : > { %2351 = vst.msk [vmem:[%s4468_s15 + $0x148] sm:$0xf] %vm2268_vm0, %v2929_v6  ;;  %2335 = vst.msk [vmem:[%s4468_s15 + $0x108] sm:$0xf] %vm2268_vm0, %v2913_v23 }
 0x24d   : > { %v2910_v48 = vpack.c.bf16 %v3339_v26, %v3339_v26  ;;  %v2894_v4 = vpack.c.bf16 %v3336_v51, %v3336_v51  ;;  %v2930_v28 = vpack.c.bf16 %v3367_v53, %v3367_v53  ;;  %v2914_v16 = vpack.c.bf16 %v3364_v9, %v3364_v9 }
 0x24e   : > { %v3436_v7 = vpop.trf.xlu1  ;;  %v3368_v56 = vpop.trf.xlu0 }
 0x24f   : > { %2332 = vst.msk [vmem:[%s4468_s15 + $0xfc] sm:$0xf] %vm2268_vm0, %v2910_v48  ;;  %2316 = vst.msk [vmem:[%s4468_s15 + $0xbc] sm:$0xf] %vm2268_vm0, %v2894_v4  ;;  %v3440_v57 = vunpack.i.h.bf16 %v3436_v7  ;;  %v3437_v14 = vunpack.i.l.bf16 %v3436_v7  ;;  %v3372_v58 = vunpack.i.h.bf16 %v3368_v56  ;;  %v3369_v12 = vunpack.i.l.bf16 %v3368_v56 }
 0x250   : > { %2352 = vst.msk [vmem:[%s4468_s15 + $0x14c] sm:$0xf] %vm2268_vm0, %v2930_v28  ;;  %2336 = vst.msk [vmem:[%s4468_s15 + $0x10c] sm:$0xf] %vm2268_vm0, %v2914_v16 }
 0x251   : > { %v2959_v22 = vpack.c.bf16 %v3440_v57, %v3440_v57  ;;  %v2943_v24 = vpack.c.bf16 %v3437_v14, %v3437_v14  ;;  %v2931_v32 = vpack.c.bf16 %v3372_v58, %v3372_v58  ;;  %v2915_v2 = vpack.c.bf16 %v3369_v12, %v3369_v12 }
 0x252   : > { %v3441_v25 = vpop.trf.xlu1  ;;  %v3373_v34 = vpop.trf.xlu0 }
 0x253   : > { %2381 = vst.msk [vmem:[%s4468_s15 + $0x1c0] sm:$0xf] %vm2268_vm0, %v2959_v22  ;;  %2365 = vst.msk [vmem:[%s4468_s15 + $0x180] sm:$0xf] %vm2268_vm0, %v2943_v24  ;;  %v3445_v8 = vunpack.i.h.bf16 %v3441_v25  ;;  %v3442_v31 = vunpack.i.l.bf16 %v3441_v25  ;;  %v3377_v42 = vunpack.i.h.bf16 %v3373_v34  ;;  %v3374_v60 = vunpack.i.l.bf16 %v3373_v34 }
 0x254   : > { %2353 = vst.msk [vmem:[%s4468_s15 + $0x150] sm:$0xf] %vm2268_vm0, %v2931_v32  ;;  %2337 = vst.msk [vmem:[%s4468_s15 + $0x110] sm:$0xf] %vm2268_vm0, %v2915_v2 }
 0x255   : > { %v2960_v18 = vpack.c.bf16 %v3445_v8, %v3445_v8  ;;  %v2944_v62 = vpack.c.bf16 %v3442_v31, %v3442_v31  ;;  %v2932_v35 = vpack.c.bf16 %v3377_v42, %v3377_v42  ;;  %v2916_v37 = vpack.c.bf16 %v3374_v60, %v3374_v60 }
 0x256   : > { %v3446_v20 = vpop.trf.xlu1  ;;  %v3378_v38 = vpop.trf.xlu0 }
 0x257   : > { %2382 = vst.msk [vmem:[%s4468_s15 + $0x1c4] sm:$0xf] %vm2268_vm0, %v2960_v18  ;;  %2366 = vst.msk [vmem:[%s4468_s15 + $0x184] sm:$0xf] %vm2268_vm0, %v2944_v62  ;;  %v3450_v43 = vunpack.i.h.bf16 %v3446_v20  ;;  %v3447_v15 = vunpack.i.l.bf16 %v3446_v20  ;;  %v3382_v1 = vunpack.i.h.bf16 %v3378_v38  ;;  %v3379_v27 = vunpack.i.l.bf16 %v3378_v38 }
 0x258   : > { %2354 = vst.msk [vmem:[%s4468_s15 + $0x154] sm:$0xf] %vm2268_vm0, %v2932_v35  ;;  %2338 = vst.msk [vmem:[%s4468_s15 + $0x114] sm:$0xf] %vm2268_vm0, %v2916_v37 }
 0x259   : > { %v2961_v10 = vpack.c.bf16 %v3450_v43, %v3450_v43  ;;  %v2945_v44 = vpack.c.bf16 %v3447_v15, %v3447_v15  ;;  %v2933_v46 = vpack.c.bf16 %v3382_v1, %v3382_v1  ;;  %v2917_v29 = vpack.c.bf16 %v3379_v27, %v3379_v27 }
 0x25a   : > { %v3451_v3 = vpop.trf.xlu1  ;;  %v3383_v49 = vpop.trf.xlu0 }
 0x25b   : > { %2383 = vst.msk [vmem:[%s4468_s15 + $0x1c8] sm:$0xf] %vm2268_vm0, %v2961_v10  ;;  %2367 = vst.msk [vmem:[%s4468_s15 + $0x188] sm:$0xf] %vm2268_vm0, %v2945_v44  ;;  %v3455_v50 = vunpack.i.h.bf16 %v3451_v3  ;;  %v3452_v5 = vunpack.i.l.bf16 %v3451_v3  ;;  %v3387_v52 = vunpack.i.h.bf16 %v3383_v49  ;;  %v3384_v33 = vunpack.i.l.bf16 %v3383_v49 }
 0x25c   : > { %2355 = vst.msk [vmem:[%s4468_s15 + $0x158] sm:$0xf] %vm2268_vm0, %v2933_v46  ;;  %2339 = vst.msk [vmem:[%s4468_s15 + $0x118] sm:$0xf] %vm2268_vm0, %v2917_v29 }
 0x25d   : > { %v2962_v61 = vpack.c.bf16 %v3455_v50, %v3455_v50  ;;  %v2946_v21 = vpack.c.bf16 %v3452_v5, %v3452_v5  ;;  %v2934_v40 = vpack.c.bf16 %v3387_v52, %v3387_v52  ;;  %v2918_v54 = vpack.c.bf16 %v3384_v33, %v3384_v33 }
 0x25e   : > { %v3456_v30 = vpop.trf.xlu1  ;;  %v3388_v11 = vpop.trf.xlu0 }
 0x25f   : > { %2384 = vst.msk [vmem:[%s4468_s15 + $0x1cc] sm:$0xf] %vm2268_vm0, %v2962_v61  ;;  %2368 = vst.msk [vmem:[%s4468_s15 + $0x18c] sm:$0xf] %vm2268_vm0, %v2946_v21  ;;  %v3460_v63 = vunpack.i.h.bf16 %v3456_v30  ;;  %v3457_v36 = vunpack.i.l.bf16 %v3456_v30  ;;  %v3392_v55 = vunpack.i.h.bf16 %v3388_v11  ;;  %v3389_v41 = vunpack.i.l.bf16 %v3388_v11 }
 0x260   : > { %2356 = vst.msk [vmem:[%s4468_s15 + $0x15c] sm:$0xf] %vm2268_vm0, %v2934_v40  ;;  %2340 = vst.msk [vmem:[%s4468_s15 + $0x11c] sm:$0xf] %vm2268_vm0, %v2918_v54 }
 0x261   : > { %v2963_v45 = vpack.c.bf16 %v3460_v63, %v3460_v63  ;;  %v2947_v39 = vpack.c.bf16 %v3457_v36, %v3457_v36  ;;  %v2935_v13 = vpack.c.bf16 %v3392_v55, %v3392_v55  ;;  %v2919_v0 = vpack.c.bf16 %v3389_v41, %v3389_v41 }
 0x262   : > { %v3461_v59 = vpop.trf.xlu1  ;;  %v3393_v19 = vpop.trf.xlu0 }
 0x263   : > { %2385 = vst.msk [vmem:[%s4468_s15 + $0x1d0] sm:$0xf] %vm2268_vm0, %v2963_v45  ;;  %2369 = vst.msk [vmem:[%s4468_s15 + $0x190] sm:$0xf] %vm2268_vm0, %v2947_v39  ;;  %v3465_v47 = vunpack.i.h.bf16 %v3461_v59  ;;  %v3462_v6 = vunpack.i.l.bf16 %v3461_v59  ;;  %v3397_v23 = vunpack.i.h.bf16 %v3393_v19  ;;  %v3394_v17 = vunpack.i.l.bf16 %v3393_v19 }
 0x264   : > { %2357 = vst.msk [vmem:[%s4468_s15 + $0x160] sm:$0xf] %vm2268_vm0, %v2935_v13  ;;  %2341 = vst.msk [vmem:[%s4468_s15 + $0x120] sm:$0xf] %vm2268_vm0, %v2919_v0 }
 0x265   : > { %v2964_v26 = vpack.c.bf16 %v3465_v47, %v3465_v47  ;;  %v2948_v51 = vpack.c.bf16 %v3462_v6, %v3462_v6  ;;  %v2936_v9 = vpack.c.bf16 %v3397_v23, %v3397_v23  ;;  %v2920_v48 = vpack.c.bf16 %v3394_v17, %v3394_v17 }
 0x266   : > { %v3466_v53 = vpop.trf.xlu1  ;;  %v3398_v4 = vpop.trf.xlu0 }
 0x267   : > { %2386 = vst.msk [vmem:[%s4468_s15 + $0x1d4] sm:$0xf] %vm2268_vm0, %v2964_v26  ;;  %2370 = vst.msk [vmem:[%s4468_s15 + $0x194] sm:$0xf] %vm2268_vm0, %v2948_v51  ;;  %v3470_v7 = vunpack.i.h.bf16 %v3466_v53  ;;  %v3467_v28 = vunpack.i.l.bf16 %v3466_v53  ;;  %v3402_v16 = vunpack.i.h.bf16 %v3398_v4  ;;  %v3399_v56 = vunpack.i.l.bf16 %v3398_v4 }
 0x268   : > { %2358 = vst.msk [vmem:[%s4468_s15 + $0x164] sm:$0xf] %vm2268_vm0, %v2936_v9  ;;  %2342 = vst.msk [vmem:[%s4468_s15 + $0x124] sm:$0xf] %vm2268_vm0, %v2920_v48 }
 0x269   : > { %v2965_v57 = vpack.c.bf16 %v3470_v7, %v3470_v7  ;;  %v2949_v14 = vpack.c.bf16 %v3467_v28, %v3467_v28  ;;  %v2937_v12 = vpack.c.bf16 %v3402_v16, %v3402_v16  ;;  %v2921_v22 = vpack.c.bf16 %v3399_v56, %v3399_v56 }
 0x26a   : > { %v3471_v58 = vpop.trf.xlu1  ;;  %v3403_v24 = vpop.trf.xlu0 }
 0x26b   : > { %2387 = vst.msk [vmem:[%s4468_s15 + $0x1d8] sm:$0xf] %vm2268_vm0, %v2965_v57  ;;  %2371 = vst.msk [vmem:[%s4468_s15 + $0x198] sm:$0xf] %vm2268_vm0, %v2949_v14  ;;  %v3475_v25 = vunpack.i.h.bf16 %v3471_v58  ;;  %v3472_v32 = vunpack.i.l.bf16 %v3471_v58  ;;  %v3407_v2 = vunpack.i.h.bf16 %v3403_v24  ;;  %v3404_v34 = vunpack.i.l.bf16 %v3403_v24 }
 0x26c   : > { %2359 = vst.msk [vmem:[%s4468_s15 + $0x168] sm:$0xf] %vm2268_vm0, %v2937_v12  ;;  %2343 = vst.msk [vmem:[%s4468_s15 + $0x128] sm:$0xf] %vm2268_vm0, %v2921_v22 }
 0x26d   : > { %v2966_v8 = vpack.c.bf16 %v3475_v25, %v3475_v25  ;;  %v2950_v31 = vpack.c.bf16 %v3472_v32, %v3472_v32  ;;  %v2938_v60 = vpack.c.bf16 %v3407_v2, %v3407_v2  ;;  %v2922_v18 = vpack.c.bf16 %v3404_v34, %v3404_v34 }
 0x26e   : > { %v3476_v42 = vpop.trf.xlu1  ;;  %v3408_v62 = vpop.trf.xlu0 }
 0x26f   : > { %2388 = vst.msk [vmem:[%s4468_s15 + $0x1dc] sm:$0xf] %vm2268_vm0, %v2966_v8  ;;  %2372 = vst.msk [vmem:[%s4468_s15 + $0x19c] sm:$0xf] %vm2268_vm0, %v2950_v31  ;;  %v3480_v20 = vunpack.i.h.bf16 %v3476_v42  ;;  %v3477_v35 = vunpack.i.l.bf16 %v3476_v42  ;;  %v3412_v37 = vunpack.i.h.bf16 %v3408_v62  ;;  %v3409_v38 = vunpack.i.l.bf16 %v3408_v62 }
 0x270   : > { %2360 = vst.msk [vmem:[%s4468_s15 + $0x16c] sm:$0xf] %vm2268_vm0, %v2938_v60  ;;  %2344 = vst.msk [vmem:[%s4468_s15 + $0x12c] sm:$0xf] %vm2268_vm0, %v2922_v18 }
 0x271   : > { %v2967_v43 = vpack.c.bf16 %v3480_v20, %v3480_v20  ;;  %v2951_v15 = vpack.c.bf16 %v3477_v35, %v3477_v35  ;;  %v2939_v27 = vpack.c.bf16 %v3412_v37, %v3412_v37  ;;  %v2923_v10 = vpack.c.bf16 %v3409_v38, %v3409_v38 }
 0x272   : > { %v3481_v1 = vpop.trf.xlu1  ;;  %v3413_v44 = vpop.trf.xlu0 }
 0x273   : > { %2389 = vst.msk [vmem:[%s4468_s15 + $0x1e0] sm:$0xf] %vm2268_vm0, %v2967_v43  ;;  %2373 = vst.msk [vmem:[%s4468_s15 + $0x1a0] sm:$0xf] %vm2268_vm0, %v2951_v15  ;;  %v3485_v3 = vunpack.i.h.bf16 %v3481_v1  ;;  %v3482_v46 = vunpack.i.l.bf16 %v3481_v1  ;;  %v3417_v29 = vunpack.i.h.bf16 %v3413_v44  ;;  %v3414_v49 = vunpack.i.l.bf16 %v3413_v44 }
 0x274   : > { %2361 = vst.msk [vmem:[%s4468_s15 + $0x170] sm:$0xf] %vm2268_vm0, %v2939_v27  ;;  %2345 = vst.msk [vmem:[%s4468_s15 + $0x130] sm:$0xf] %vm2268_vm0, %v2923_v10 }
 0x275   : > { %v2968_v50 = vpack.c.bf16 %v3485_v3, %v3485_v3  ;;  %v2952_v5 = vpack.c.bf16 %v3482_v46, %v3482_v46  ;;  %v2940_v33 = vpack.c.bf16 %v3417_v29, %v3417_v29  ;;  %v2924_v61 = vpack.c.bf16 %v3414_v49, %v3414_v49 }
 0x276   : > { %v3486_v52 = vpop.trf.xlu1  ;;  %v3418_v21 = vpop.trf.xlu0 }
 0x277   : > { %2390 = vst.msk [vmem:[%s4468_s15 + $0x1e4] sm:$0xf] %vm2268_vm0, %v2968_v50  ;;  %2374 = vst.msk [vmem:[%s4468_s15 + $0x1a4] sm:$0xf] %vm2268_vm0, %v2952_v5  ;;  %v3490_v30 = vunpack.i.h.bf16 %v3486_v52  ;;  %v3487_v40 = vunpack.i.l.bf16 %v3486_v52  ;;  %v3422_v54 = vunpack.i.h.bf16 %v3418_v21  ;;  %v3419_v11 = vunpack.i.l.bf16 %v3418_v21 }
 0x278   : > { %2362 = vst.msk [vmem:[%s4468_s15 + $0x174] sm:$0xf] %vm2268_vm0, %v2940_v33  ;;  %2346 = vst.msk [vmem:[%s4468_s15 + $0x134] sm:$0xf] %vm2268_vm0, %v2924_v61 }
 0x279   : > { %v2969_v63 = vpack.c.bf16 %v3490_v30, %v3490_v30  ;;  %v2953_v36 = vpack.c.bf16 %v3487_v40, %v3487_v40  ;;  %v2941_v41 = vpack.c.bf16 %v3422_v54, %v3422_v54  ;;  %v2925_v45 = vpack.c.bf16 %v3419_v11, %v3419_v11 }
 0x27a   : > { %v3491_v55 = vpop.trf.xlu1  ;;  %v3423_v39 = vpop.trf.xlu0 }
 0x27b   : > { %2391 = vst.msk [vmem:[%s4468_s15 + $0x1e8] sm:$0xf] %vm2268_vm0, %v2969_v63  ;;  %2375 = vst.msk [vmem:[%s4468_s15 + $0x1a8] sm:$0xf] %vm2268_vm0, %v2953_v36  ;;  %v3495_v59 = vunpack.i.h.bf16 %v3491_v55  ;;  %v3492_v13 = vunpack.i.l.bf16 %v3491_v55  ;;  %v3427_v0 = vunpack.i.h.bf16 %v3423_v39  ;;  %v3424_v19 = vunpack.i.l.bf16 %v3423_v39 }
 0x27c   : > { %2363 = vst.msk [vmem:[%s4468_s15 + $0x178] sm:$0xf] %vm2268_vm0, %v2941_v41  ;;  %2347 = vst.msk [vmem:[%s4468_s15 + $0x138] sm:$0xf] %vm2268_vm0, %v2925_v45 }
 0x27d   : > { %v2970_v47 = vpack.c.bf16 %v3495_v59, %v3495_v59  ;;  %v2954_v6 = vpack.c.bf16 %v3492_v13, %v3492_v13  ;;  %v2942_v17 = vpack.c.bf16 %v3427_v0, %v3427_v0  ;;  %v2926_v26 = vpack.c.bf16 %v3424_v19, %v3424_v19 }
 0x27e   : > { %v3496_v23 = vpop.trf.xlu1 }
 0x27f   : > { %2392 = vst.msk [vmem:[%s4468_s15 + $0x1ec] sm:$0xf] %vm2268_vm0, %v2970_v47  ;;  %2376 = vst.msk [vmem:[%s4468_s15 + $0x1ac] sm:$0xf] %vm2268_vm0, %v2954_v6  ;;  %v3500_v51 = vunpack.i.h.bf16 %v3496_v23  ;;  %v3497_v53 = vunpack.i.l.bf16 %v3496_v23 }
 0x280   : > { %2364 = vst.msk [vmem:[%s4468_s15 + $0x17c] sm:$0xf] %vm2268_vm0, %v2942_v17  ;;  %2348 = vst.msk [vmem:[%s4468_s15 + $0x13c] sm:$0xf] %vm2268_vm0, %v2926_v26 }
 0x281   : > { %v2971_v9 = vpack.c.bf16 %v3500_v51, %v3500_v51  ;;  %v2955_v48 = vpack.c.bf16 %v3497_v53, %v3497_v53 }
 0x282   : > { %v3501_v4 = vpop.trf.xlu1 }
 0x283   : > { %2393 = vst.msk [vmem:[%s4468_s15 + $0x1f0] sm:$0xf] %vm2268_vm0, %v2971_v9  ;;  %2377 = vst.msk [vmem:[%s4468_s15 + $0x1b0] sm:$0xf] %vm2268_vm0, %v2955_v48  ;;  %v3505_v7 = vunpack.i.h.bf16 %v3501_v4  ;;  %v3502_v28 = vunpack.i.l.bf16 %v3501_v4 }
 0x285   : > { %v2972_v16 = vpack.c.bf16 %v3505_v7, %v3505_v7  ;;  %v2956_v56 = vpack.c.bf16 %v3502_v28, %v3502_v28 }
 0x286   : > { %v3506_v57 = vpop.trf.xlu1 }
 0x287   : > { %2394 = vst.msk [vmem:[%s4468_s15 + $0x1f4] sm:$0xf] %vm2268_vm0, %v2972_v16  ;;  %2378 = vst.msk [vmem:[%s4468_s15 + $0x1b4] sm:$0xf] %vm2268_vm0, %v2956_v56  ;;  %v3510_v14 = vunpack.i.h.bf16 %v3506_v57  ;;  %v3507_v58 = vunpack.i.l.bf16 %v3506_v57 }
 0x289   : > { %v2973_v12 = vpack.c.bf16 %v3510_v14, %v3510_v14  ;;  %v2957_v22 = vpack.c.bf16 %v3507_v58, %v3507_v58 }
 0x28a   : > { %v3511_v24 = vpop.trf.xlu1 }
 0x28b   : > { %2395 = vst.msk [vmem:[%s4468_s15 + $0x1f8] sm:$0xf] %vm2268_vm0, %v2973_v12  ;;  %2379 = vst.msk [vmem:[%s4468_s15 + $0x1b8] sm:$0xf] %vm2268_vm0, %v2957_v22  ;;  %v3515_v25 = vunpack.i.h.bf16 %v3511_v24  ;;  %v3512_v32 = vunpack.i.l.bf16 %v3511_v24 }
 0x28d   : > { %v2974_v2 = vpack.c.bf16 %v3515_v25, %v3515_v25  ;;  %v2958_v34 = vpack.c.bf16 %v3512_v32, %v3512_v32 }
 0x28f   : > { %2396 = vst.msk [vmem:[%s4468_s15 + $0x1fc] sm:$0xf] %vm2268_vm0, %v2974_v2  ;;  %2380 = vst.msk [vmem:[%s4468_s15 + $0x1bc] sm:$0xf] %vm2268_vm0, %v2958_v34 }
 0x290 PF: > { %s2476_s22 = sand.u32 1, %s3664_s30   ;;  %p4850_p11 = scmp.ne.s32.totalorder %s4842_s24, 0 }
 0x291   : > { %p4851_p4 = scmp.ge.s32.totalorder %s3684_s14, 2  ;;  %s2477_s16 = scalar_lea.sflag [#allocation4], %s2476_s22 }
 0x293   : > { %p3100_p7 = pnand %p4851_p4, %p4850_p11 }
 0x295   : > { %3655 = dma.done.wait (!%p3100_p7), %s2477_s16, 2048  }
 0x296   : > { %3657 = vsyncadd (!%p3100_p7), %s2477_s16, 4294965248  ;;  %s2486_s26 = scalar_lea.sflag [#allocation7], %s2476_s22 }
 0x297   : > { %3659 = dma.done.wait (!%p3100_p7), %s2486_s26, 2048  }
 0x298   : > { %3661 = vsyncadd (!%p3100_p7), %s2486_s26, 4294965248  ;;  %s29_s14 = sadd.s32 1, %s3684_s14   ;;  %s4852_s15 = sld [smem:[#allocation11_spill]] }
 0x299   : > { %p26_p10 = scmp.ge.s32.totalorder %s29_s14, 4   ;;  %s4853_s30 = smov %s3668_s10 }
 0x29a   : > { %s4854_s10 = smov %s3672_s11  ;;  %s4855_s11 = smov %s3800_s23 }
 0x29b   : > { %s4856_s12 = smov %s3680_s13  ;;  %28 = sbr.rel (!%p26_p10) target bundleno = 10 (0xa), region = 122 }
 0x29e   : > { %s4857_s13 = smov %s4852_s15 }
 0x2a2   :  { %2491 = vsyncpa [#allocation3], 1 }
 0x2a3   :  { %2493 = vsyncpa [#allocation3 + $0x1], 1 }
 0x2a4   :  { %2494 = vsyncpa [#allocation4], 1 }
 0x2a5   :  { %2496 = vsyncpa [#allocation4 + $0x1], 1 }
 0x2a6   :  { %2497 = vsyncpa [#allocation7], 1 }
 0x2a7   :  { %2499 = vsyncpa [#allocation7 + $0x1], 1 }

</bundles_post_ra>
